<compile_context>
chip_gen: v7x
topology: tpu7x:2x2x1
jax: 0.10.0
libtpu: 0.0.40
codegen_flags: <defaults>
</compile_context>

<pallas_src>
import functools

import jax
import jax.numpy as jnp
import numpy as np
from jax.experimental import pallas as pl
from jax.experimental.pallas import tpu as pltpu


# ----------------------------- shared math ---------------------------------
def _layernorm(x, gamma, beta, eps=1e-5):
    mu = jnp.mean(x, axis=-1, keepdims=True)
    var = jnp.mean((x - mu) ** 2, axis=-1, keepdims=True)   # biased, like torch LN
    return (x - mu) * jax.lax.rsqrt(var + eps) * gamma + beta


# Pure-JAX reference (per-head loop, exact softmax) — used only for checking.
def _mha_reference(values, keys, queries, wv, wk, wq, wfc, bfc, mask, num_heads):
    S, E = queries.shape
    D = E // num_heads
    scale = 1.0 / jnp.sqrt(jnp.float32(E))
    head_outs = []
    for h in range(num_heads):
        sl = slice(h * D, (h + 1) * D)
        vh = values[:, sl] @ wv
        kh = keys[:, sl] @ wk
        qh = queries[:, sl] @ wq
        energy = qh @ kh.T
        if mask is not None:
            energy = jnp.where(mask == 0, jnp.float32(-1e20), energy)
        attn = jax.nn.softmax(energy * scale, axis=-1)
        head_outs.append(attn @ vh)
    return jnp.concatenate(head_outs, axis=-1) @ wfc + bfc


# ------------------------------- kernel -------------------------------------
def decoder_subsection_kernel(
        mask_ref, x_ref, vin_ref, kin_ref,
        wq1_ref, wk1_ref, wv1_ref, wfc1_ref, bfc1_ref, g0_ref, b0_ref,
        wq2_ref, wk2_ref, wv2_ref, wfc2_ref, bfc2_ref, g1_ref, b1_ref,
        wff1_ref, bff1_ref, wff2_ref, bff2_ref, g2_ref, b2_ref,
        out_ref, *, num_heads, block_batch, matmul_dtype):
    Bt = block_batch
    H = num_heads
    _, S, E = x_ref.shape
    D = E // H

    def mm(a):  # cast MXU operands only; accumulation stays f32
        return a.astype(matmul_dtype)

    # Flatten (Bt, S, E) -> (Bt*S, E): all projections / FF become single
    # lane-dense matmuls batched over batch-block and sequence.
    x = x_ref[...].reshape(Bt * S, E)
    vin = vin_ref[...].reshape(Bt * S, E)
    kin = kin_ref[...].reshape(Bt * S, E)

    # Additive mask, built once per grid step (not per head), broadcast to
    # every head (head-major ordering to match `heads()` below).
    add_mask = jnp.where(mask_ref[...] == 0.0,
                         jnp.float32(-1e20), jnp.float32(0.0))       # (Bt,S,S)
    add_mask = jnp.concatenate([add_mask] * H, axis=0)               # (H*Bt,S,S)

    scale = 1.0 / jnp.sqrt(jnp.float32(E))

    def heads(a):
        # (Bt*S, E) -> (H*Bt, S, D), head-major along the leading axis.
        return jnp.concatenate(
            [a[:, h * D:(h + 1) * D].reshape(Bt, S, D) for h in range(H)],
            axis=0)

    def unheads(ctx):
        # (H*Bt, S, D) head-major -> (Bt*S, E)
        return jnp.concatenate(
            [ctx[h * Bt:(h + 1) * Bt].reshape(Bt * S, D) for h in range(H)],
            axis=-1)

    def mha(values, keys, queries, wv_bd, wk_bd, wq_bd, wfc, bfc, amask):
        # Block-diagonal (E,E) projections: one matmul each instead of H
        # tiny (D,D) matmuls.
        v = jnp.dot(mm(values), mm(wv_bd), preferred_element_type=jnp.float32)
        k = jnp.dot(mm(keys), mm(wk_bd), preferred_element_type=jnp.float32)
        q = jnp.dot(mm(queries), mm(wq_bd), preferred_element_type=jnp.float32)

        qh, kh, vh = heads(q), heads(k), heads(v)
        # Contract last dims directly (no explicit K^T / XLU transpose).
        energy = jnp.einsum('bqd,bkd->bqk', mm(qh), mm(kh),
                            preferred_element_type=jnp.float32)       # f32
        if amask is not None:
            energy = energy + amask                                   # f32 add
        logits = energy * scale
        m = jnp.max(logits, axis=-1, keepdims=True)
        p = jnp.exp(logits - m)
        denom = jnp.sum(p, axis=-1, keepdims=True)
        attn = p * pl.reciprocal(denom, approx=True)                  # EUP slot
        ctx = jnp.einsum('bqk,bkd->bqd', mm(attn), mm(vh),
                         preferred_element_type=jnp.float32)          # (H*Bt,S,D)
        concat = unheads(ctx)                                         # (Bt*S,E)
        return jnp.dot(mm(concat), mm(wfc),
                       preferred_element_type=jnp.float32) + bfc

    # --- masked self-attention on x ---
    attn1 = mha(x, x, x, wv1_ref[...], wk1_ref[...], wq1_ref[...],
                wfc1_ref[...], bfc1_ref[...], add_mask)

    # --- AddNorm + dropout (identity in eval) ---  f32 elementwise math
    query = _layernorm(attn1 + x, g0_ref[...], b0_ref[...])

    # --- TransformerBlock: cross attention (value_input, key_input, query) ---
    attn2 = mha(vin, kin, query, wv2_ref[...], wk2_ref[...], wq2_ref[...],
                wfc2_ref[...], bfc2_ref[...], None)
    h1 = _layernorm(attn2 + query, g1_ref[...], b1_ref[...])

    # --- feed-forward: Linear -> ReLU -> Linear ---
    ff = jnp.maximum(
        jnp.dot(mm(h1), mm(wff1_ref[...]), preferred_element_type=jnp.float32)
        + bff1_ref[...], 0.0)
    ff = jnp.dot(mm(ff), mm(wff2_ref[...]), preferred_element_type=jnp.float32) \
        + bff2_ref[...]

    out = _layernorm(ff + h1, g2_ref[...], b2_ref[...])
    out_ref[...] = out.reshape(Bt, S, E).astype(out_ref.dtype)


# ------------------------------- wrapper -------------------------------------
_WEIGHT_ORDER = ["wq1", "wk1", "wv1", "wfc1", "bfc1", "g0", "b0",
                 "wq2", "wk2", "wv2", "wfc2", "bfc2", "g1", "b1",
                 "wff1", "bff1", "wff2", "bff2", "g2", "b2"]


def decoder_subsection(x, value_input, key_input, mask, params, num_heads,
                       block_batch=None, matmul_dtype=jnp.float32):
    N, S, E = x.shape
    H = num_heads
    if block_batch is None:
        # Amortize per-grid-step overhead, but keep >= 2 parallel steps so the
        # two v7x TensorCores both get work (no-op on 1-TC v5e/v6e).
        block_batch = max(1, N // 2)
    assert N % block_batch == 0, "batch must be divisible by block_batch"

    # Fold the shared per-head (D,D) projection into a block-diagonal (E,E):
    # x @ kron(I_H, W) == per-head x_h @ W, so one matmul replaces H tiny ones.
    eye_h = jnp.eye(H, dtype=params["wq1"].dtype)
    p = dict(params)
    for k_ in ("wq1", "wk1", "wv1", "wq2", "wk2", "wv2"):
        p[k_] = jnp.kron(eye_h, params[k_])

    if matmul_dtype != jnp.float32:
        # bf16 MXU-input mode (v6e/v7x): bf16 weights halve weight DMA bytes;
        # biases / layernorm params stay f32 (v5e VPU/EUP have no bf16).
        for k_ in ("wq1", "wk1", "wv1", "wfc1", "wq2", "wk2", "wv2", "wfc2",
                   "wff1", "wff2"):
            p[k_] = p[k_].astype(matmul_dtype)

    # Drop the broadcast head dim of the mask: DMA (Bt,S,S) per step, not
    # (Bt,1,S,S); the additive form is built once in-kernel, not per head.
    mask3 = mask.reshape(N, S, S)

    kernel = functools.partial(decoder_subsection_kernel, num_heads=H,
                               block_batch=block_batch,
                               matmul_dtype=matmul_dtype)

    def full_spec(shape):
        nd = len(shape)
        return pl.BlockSpec(shape, lambda b, _n=nd: (0,) * _n)

    act_spec = pl.BlockSpec((block_batch, S, E), lambda b: (b, 0, 0))
    mask_spec = pl.BlockSpec((block_batch, S, S), lambda b: (b, 0, 0))

    weights = [p[k_] for k_ in _WEIGHT_ORDER]
    in_specs = [mask_spec, act_spec, act_spec, act_spec] + \
               [full_spec(w.shape) for w in weights]

    # TODO(synk): at production scale (E >= 1024, F = 4E) the FF weights need a
    # K/F-tiled "arbitrary" grid axis and an explicit vmem_limit_bytes to fit
    # v7x's 64 MiB VMEM; at E=32 everything is resident trivially.
    return pl.pallas_call(
        kernel,
        out_shape=jax.ShapeDtypeStruct((N, S, E), x.dtype),
        grid=(N // block_batch,),
        in_specs=in_specs,
        out_specs=act_spec,
        compiler_params=pltpu.CompilerParams(
            dimension_semantics=("parallel",)),
    )(mask3, x, value_input, key_input, *weights)


# --------------------------- params & reference ------------------------------
def init_params(key, E, num_heads, forward_expansion):
    D = E // num_heads
    F = forward_expansion * E
    ks = jax.random.split(key, 10)

    def lin(k, fan_in, shape):
        return jax.random.normal(k, shape, jnp.float32) / jnp.sqrt(float(fan_in))

    return dict(
        wq1=lin(ks[0], D, (D, D)), wk1=lin(ks[1], D, (D, D)),
        wv1=lin(ks[2], D, (D, D)),
        wfc1=lin(ks[3], E, (E, E)), bfc1=jnp.zeros((1, E), jnp.float32),
        g0=jnp.ones((1, E), jnp.float32), b0=jnp.zeros((1, E), jnp.float32),
        wq2=lin(ks[4], D, (D, D)), wk2=lin(ks[5], D, (D, D)),
        wv2=lin(ks[6], D, (D, D)),
        wfc2=lin(ks[7], E, (E, E)), bfc2=jnp.zeros((1, E), jnp.float32),
        g1=jnp.ones((1, E), jnp.float32), b1=jnp.zeros((1, E), jnp.float32),
        wff1=lin(ks[8], E, (E, F)), bff1=jnp.zeros((1, F), jnp.float32),
        wff2=lin(ks[9], F, (F, E)), bff2=jnp.zeros((1, E), jnp.float32),
        g2=jnp.ones((1, E), jnp.float32), b2=jnp.zeros((1, E), jnp.float32),
    )


def reference(x, vin, kin, mask, p, num_heads):
    outs = []
    for b in range(x.shape[0]):
        xb, vb, kb, mb = x[b], vin[b], kin[b], mask[b, 0]
        a1 = _mha_reference(xb, xb, xb, p["wv1"], p["wk1"], p["wq1"],
                            p["wfc1"], p["bfc1"], mb, num_heads)
        q = _layernorm(a1 + xb, p["g0"], p["b0"])
        a2 = _mha_reference(vb, kb, q, p["wv2"], p["wk2"], p["wq2"],
                            p["wfc2"], p["bfc2"], None, num_heads)
        h1 = _layernorm(a2 + q, p["g1"], p["b1"])
        ff = jnp.maximum(h1 @ p["wff1"] + p["bff1"], 0.0)
        ff = ff @ p["wff2"] + p["bff2"]
        outs.append(_layernorm(ff + h1, p["g2"], p["b2"]))
    return jnp.stack(outs)


# --------------------------------- main --------------------------------------
if __name__ == "__main__":
    N, S, E = 2, 8, 32
    NUM_HEADS = 4
    FWD_EXP = 4
    # TODO(synk): dropout_prob is accepted by the PyTorch module but dropout is
    # identity in eval mode, so it is not modeled in the kernel.

    root = jax.random.PRNGKey(0)
    kx, kv, kk, kp = jax.random.split(root, 4)
    x = jax.random.normal(kx, (N, S, E), jnp.float32)
    value_input = jax.random.normal(kv, (N, S, E), jnp.float32)
    key_input = jax.random.normal(kk, (N, S, E), jnp.float32)
    # causal decoder mask, (N, 1, S, S); 0 => masked out
    mask = jnp.broadcast_to(jnp.tril(jnp.ones((S, S), jnp.float32)),
                            (N, 1, S, S))

    params = init_params(kp, E, NUM_HEADS, FWD_EXP)
    ref = reference(x, value_input, key_input, mask, params, NUM_HEADS)

    # f32 MXU inputs (v5e-friendly). Tolerance accounts for the approximate
    # EUP reciprocal used in the in-kernel softmax.
    out = decoder_subsection(x, value_input, key_input, mask, params,
                             NUM_HEADS)
    out = jax.block_until_ready(out)
    np.testing.assert_allclose(np.asarray(out), np.asarray(ref),
                               rtol=1e-2, atol=1e-2)

    # bf16 MXU-input variant (v6e/v7x): f32 accumulation, f32 LN/softmax.
    out_bf16 = decoder_subsection(x, value_input, key_input, mask, params,
                                  NUM_HEADS, matmul_dtype=jnp.bfloat16)
    out_bf16 = jax.block_until_ready(out_bf16)
    np.testing.assert_allclose(np.asarray(out_bf16), np.asarray(ref),
                               rtol=1e-1, atol=1e-1)

    print("KERNEL_OK")
</pallas_src>

<mosaic_0001>
module attributes {stable_mosaic.version = 11 : i64} {
  func.func @decoder_subsection_kernel(%arg0: i32, %arg1: memref<1x8x8xf32, #tpu.memory_space<vmem>>, %arg2: memref<1x8x32xf32, #tpu.memory_space<vmem>>, %arg3: memref<1x8x32xf32, #tpu.memory_space<vmem>>, %arg4: memref<1x8x32xf32, #tpu.memory_space<vmem>>, %arg5: memref<32x32xf32, #tpu.memory_space<vmem>>, %arg6: memref<32x32xf32, #tpu.memory_space<vmem>>, %arg7: memref<32x32xf32, #tpu.memory_space<vmem>>, %arg8: memref<32x32xf32, #tpu.memory_space<vmem>>, %arg9: memref<1x32xf32, #tpu.memory_space<vmem>>, %arg10: memref<1x32xf32, #tpu.memory_space<vmem>>, %arg11: memref<1x32xf32, #tpu.memory_space<vmem>>, %arg12: memref<32x32xf32, #tpu.memory_space<vmem>>, %arg13: memref<32x32xf32, #tpu.memory_space<vmem>>, %arg14: memref<32x32xf32, #tpu.memory_space<vmem>>, %arg15: memref<32x32xf32, #tpu.memory_space<vmem>>, %arg16: memref<1x32xf32, #tpu.memory_space<vmem>>, %arg17: memref<1x32xf32, #tpu.memory_space<vmem>>, %arg18: memref<1x32xf32, #tpu.memory_space<vmem>>, %arg19: memref<32x128xf32, #tpu.memory_space<vmem>>, %arg20: memref<1x128xf32, #tpu.memory_space<vmem>>, %arg21: memref<128x32xf32, #tpu.memory_space<vmem>>, %arg22: memref<1x32xf32, #tpu.memory_space<vmem>>, %arg23: memref<1x32xf32, #tpu.memory_space<vmem>>, %arg24: memref<1x32xf32, #tpu.memory_space<vmem>>, %arg25: memref<1x8x32xf32, #tpu.memory_space<vmem>>) attributes {dimension_semantics = [#tpu.dimension_semantics<parallel>], iteration_bounds = array<i64: 2>, scalar_prefetch = 0 : i64, scratch_operands = 0 : i64, tpu.core_type = #tpu.core_type<tc>, window_params = [{transform_indices = @transform_0, window_bounds = array<i64: 1, 8, 8>}, {transform_indices = @transform_1, window_bounds = array<i64: 1, 8, 32>}, {transform_indices = @transform_2, window_bounds = array<i64: 1, 8, 32>}, {transform_indices = @transform_3, window_bounds = array<i64: 1, 8, 32>}, {pipeline_mode = #tpu.pipeline_mode<synchronous>, transform_indices = @transform_4, window_bounds = array<i64: 32, 32>}, {pipeline_mode = #tpu.pipeline_mode<synchronous>, transform_indices = @transform_5, window_bounds = array<i64: 32, 32>}, {pipeline_mode = #tpu.pipeline_mode<synchronous>, transform_indices = @transform_6, window_bounds = array<i64: 32, 32>}, {pipeline_mode = #tpu.pipeline_mode<synchronous>, transform_indices = @transform_7, window_bounds = array<i64: 32, 32>}, {pipeline_mode = #tpu.pipeline_mode<synchronous>, transform_indices = @transform_8, window_bounds = array<i64: 1, 32>}, {pipeline_mode = #tpu.pipeline_mode<synchronous>, transform_indices = @transform_9, window_bounds = array<i64: 1, 32>}, {pipeline_mode = #tpu.pipeline_mode<synchronous>, transform_indices = @transform_10, window_bounds = array<i64: 1, 32>}, {pipeline_mode = #tpu.pipeline_mode<synchronous>, transform_indices = @transform_11, window_bounds = array<i64: 32, 32>}, {pipeline_mode = #tpu.pipeline_mode<synchronous>, transform_indices = @transform_12, window_bounds = array<i64: 32, 32>}, {pipeline_mode = #tpu.pipeline_mode<synchronous>, transform_indices = @transform_13, window_bounds = array<i64: 32, 32>}, {pipeline_mode = #tpu.pipeline_mode<synchronous>, transform_indices = @transform_14, window_bounds = array<i64: 32, 32>}, {pipeline_mode = #tpu.pipeline_mode<synchronous>, transform_indices = @transform_15, window_bounds = array<i64: 1, 32>}, {pipeline_mode = #tpu.pipeline_mode<synchronous>, transform_indices = @transform_16, window_bounds = array<i64: 1, 32>}, {pipeline_mode = #tpu.pipeline_mode<synchronous>, transform_indices = @transform_17, window_bounds = array<i64: 1, 32>}, {pipeline_mode = #tpu.pipeline_mode<synchronous>, transform_indices = @transform_18, window_bounds = array<i64: 32, 128>}, {pipeline_mode = #tpu.pipeline_mode<synchronous>, transform_indices = @transform_19, window_bounds = array<i64: 1, 128>}, {pipeline_mode = #tpu.pipeline_mode<synchronous>, transform_indices = @transform_20, window_bounds = array<i64: 128, 32>}, {pipeline_mode = #tpu.pipeline_mode<synchronous>, transform_indices = @transform_21, window_bounds = array<i64: 1, 32>}, {pipeline_mode = #tpu.pipeline_mode<synchronous>, transform_indices = @transform_22, window_bounds = array<i64: 1, 32>}, {pipeline_mode = #tpu.pipeline_mode<synchronous>, transform_indices = @transform_23, window_bounds = array<i64: 1, 32>}, {transform_indices = @transform_24, window_bounds = array<i64: 1, 8, 32>}]} {
    %c0 = arith.constant 0 : index
    %c0_0 = arith.constant 0 : index
    %c0_1 = arith.constant 0 : index
    %0 = vector.load %arg2[%c0, %c0_0, %c0_1] : memref<1x8x32xf32, #tpu.memory_space<vmem>>, vector<1x8x32xf32>
    %1 = vector.shape_cast %0 : vector<1x8x32xf32> to vector<8x32xf32>
    %c0_2 = arith.constant 0 : index
    %c0_3 = arith.constant 0 : index
    %c0_4 = arith.constant 0 : index
    %2 = vector.load %arg3[%c0_2, %c0_3, %c0_4] : memref<1x8x32xf32, #tpu.memory_space<vmem>>, vector<1x8x32xf32>
    %3 = vector.shape_cast %2 : vector<1x8x32xf32> to vector<8x32xf32>
    %c0_5 = arith.constant 0 : index
    %c0_6 = arith.constant 0 : index
    %c0_7 = arith.constant 0 : index
    %4 = vector.load %arg4[%c0_5, %c0_6, %c0_7] : memref<1x8x32xf32, #tpu.memory_space<vmem>>, vector<1x8x32xf32>
    %5 = vector.shape_cast %4 : vector<1x8x32xf32> to vector<8x32xf32>
    %c0_8 = arith.constant 0 : index
    %c0_9 = arith.constant 0 : index
    %c0_10 = arith.constant 0 : index
    %6 = vector.load %arg1[%c0_8, %c0_9, %c0_10] : memref<1x8x8xf32, #tpu.memory_space<vmem>>, vector<1x8x8xf32>
    %cst = arith.constant 0.000000e+00 : f32
    %7 = vector.broadcast %cst : f32 to vector<1x8x8xf32>
    %8 = arith.cmpf oeq, %6, %7 : vector<1x8x8xf32>
    %cst_11 = arith.constant -1.000000e+20 : f32
    %cst_12 = arith.constant 0.000000e+00 : f32
    %9 = vector.broadcast %cst_11 : f32 to vector<1x8x8xf32>
    %10 = vector.broadcast %cst_12 : f32 to vector<1x8x8xf32>
    %11 = arith.select %8, %9, %10 : vector<1x8x8xi1>, vector<1x8x8xf32>
    %12 = tpu.concatenate %11, %11, %11, %11 in 0 : vector<1x8x8xf32>, vector<1x8x8xf32>, vector<1x8x8xf32>, vector<1x8x8xf32> -> vector<4x8x8xf32>
    %cst_13 = arith.constant 3.200000e+01 : f32
    %13 = math.sqrt %cst_13 : f32
    %cst_14 = arith.constant 1.000000e+00 : f32
    %14 = arith.divf %cst_14, %13 : f32
    %c0_15 = arith.constant 0 : index
    %c0_16 = arith.constant 0 : index
    %15 = vector.load %arg7[%c0_15, %c0_16] : memref<32x32xf32, #tpu.memory_space<vmem>>, vector<32x32xf32>
    %c0_17 = arith.constant 0 : index
    %c0_18 = arith.constant 0 : index
    %16 = vector.load %arg6[%c0_17, %c0_18] : memref<32x32xf32, #tpu.memory_space<vmem>>, vector<32x32xf32>
    %c0_19 = arith.constant 0 : index
    %c0_20 = arith.constant 0 : index
    %17 = vector.load %arg5[%c0_19, %c0_20] : memref<32x32xf32, #tpu.memory_space<vmem>>, vector<32x32xf32>
    %c0_21 = arith.constant 0 : index
    %c0_22 = arith.constant 0 : index
    %18 = vector.load %arg8[%c0_21, %c0_22] : memref<32x32xf32, #tpu.memory_space<vmem>>, vector<32x32xf32>
    %c0_23 = arith.constant 0 : index
    %c0_24 = arith.constant 0 : index
    %19 = vector.load %arg9[%c0_23, %c0_24] : memref<1x32xf32, #tpu.memory_space<vmem>>, vector<1x32xf32>
    %cst_25 = arith.constant dense<0.000000e+00> : vector<8x32xf32>
    %20 = tpu.matmul %1, %15, %cst_25 {dimension_numbers = #tpu.dot_dimension_numbers<[1], [0], [0], [1], [0, 0, 1, 1], [], []>} : vector<8x32xf32>, vector<32x32xf32>, vector<8x32xf32> -> vector<8x32xf32>
    %cst_26 = arith.constant dense<0.000000e+00> : vector<8x32xf32>
    %21 = tpu.matmul %1, %16, %cst_26 {dimension_numbers = #tpu.dot_dimension_numbers<[1], [0], [0], [1], [0, 0, 1, 1], [], []>} : vector<8x32xf32>, vector<32x32xf32>, vector<8x32xf32> -> vector<8x32xf32>
    %cst_27 = arith.constant dense<0.000000e+00> : vector<8x32xf32>
    %22 = tpu.matmul %1, %17, %cst_27 {dimension_numbers = #tpu.dot_dimension_numbers<[1], [0], [0], [1], [0, 0, 1, 1], [], []>} : vector<8x32xf32>, vector<32x32xf32>, vector<8x32xf32> -> vector<8x32xf32>
    %23 = vector.extract_strided_slice %22 {offsets = [0, 0], sizes = [8, 8], strides = [1, 1]} : vector<8x32xf32> to vector<8x8xf32>
    %24 = vector.shape_cast %23 : vector<8x8xf32> to vector<1x8x8xf32>
    %25 = vector.extract_strided_slice %22 {offsets = [0, 8], sizes = [8, 8], strides = [1, 1]} : vector<8x32xf32> to vector<8x8xf32>
    %26 = vector.shape_cast %25 : vector<8x8xf32> to vector<1x8x8xf32>
    %27 = vector.extract_strided_slice %22 {offsets = [0, 16], sizes = [8, 8], strides = [1, 1]} : vector<8x32xf32> to vector<8x8xf32>
    %28 = vector.shape_cast %27 : vector<8x8xf32> to vector<1x8x8xf32>
    %29 = vector.extract_strided_slice %22 {offsets = [0, 24], sizes = [8, 8], strides = [1, 1]} : vector<8x32xf32> to vector<8x8xf32>
    %30 = vector.shape_cast %29 : vector<8x8xf32> to vector<1x8x8xf32>
    %31 = tpu.concatenate %24, %26, %28, %30 in 0 : vector<1x8x8xf32>, vector<1x8x8xf32>, vector<1x8x8xf32>, vector<1x8x8xf32> -> vector<4x8x8xf32>
    %32 = vector.extract_strided_slice %21 {offsets = [0, 0], sizes = [8, 8], strides = [1, 1]} : vector<8x32xf32> to vector<8x8xf32>
    %33 = vector.shape_cast %32 : vector<8x8xf32> to vector<1x8x8xf32>
    %34 = vector.extract_strided_slice %21 {offsets = [0, 8], sizes = [8, 8], strides = [1, 1]} : vector<8x32xf32> to vector<8x8xf32>
    %35 = vector.shape_cast %34 : vector<8x8xf32> to vector<1x8x8xf32>
    %36 = vector.extract_strided_slice %21 {offsets = [0, 16], sizes = [8, 8], strides = [1, 1]} : vector<8x32xf32> to vector<8x8xf32>
    %37 = vector.shape_cast %36 : vector<8x8xf32> to vector<1x8x8xf32>
    %38 = vector.extract_strided_slice %21 {offsets = [0, 24], sizes = [8, 8], strides = [1, 1]} : vector<8x32xf32> to vector<8x8xf32>
    %39 = vector.shape_cast %38 : vector<8x8xf32> to vector<1x8x8xf32>
    %40 = tpu.concatenate %33, %35, %37, %39 in 0 : vector<1x8x8xf32>, vector<1x8x8xf32>, vector<1x8x8xf32>, vector<1x8x8xf32> -> vector<4x8x8xf32>
    %41 = vector.extract_strided_slice %20 {offsets = [0, 0], sizes = [8, 8], strides = [1, 1]} : vector<8x32xf32> to vector<8x8xf32>
    %42 = vector.shape_cast %41 : vector<8x8xf32> to vector<1x8x8xf32>
    %43 = vector.extract_strided_slice %20 {offsets = [0, 8], sizes = [8, 8], strides = [1, 1]} : vector<8x32xf32> to vector<8x8xf32>
    %44 = vector.shape_cast %43 : vector<8x8xf32> to vector<1x8x8xf32>
    %45 = vector.extract_strided_slice %20 {offsets = [0, 16], sizes = [8, 8], strides = [1, 1]} : vector<8x32xf32> to vector<8x8xf32>
    %46 = vector.shape_cast %45 : vector<8x8xf32> to vector<1x8x8xf32>
    %47 = vector.extract_strided_slice %20 {offsets = [0, 24], sizes = [8, 8], strides = [1, 1]} : vector<8x32xf32> to vector<8x8xf32>
    %48 = vector.shape_cast %47 : vector<8x8xf32> to vector<1x8x8xf32>
    %49 = tpu.concatenate %42, %44, %46, %48 in 0 : vector<1x8x8xf32>, vector<1x8x8xf32>, vector<1x8x8xf32>, vector<1x8x8xf32> -> vector<4x8x8xf32>
    "tpu.trace_start"() <{level = 10 : i32, message = "bqd,bkd->bqk"}> : () -> ()
    %cst_28 = arith.constant dense<0.000000e+00> : vector<4x8x8xf32>
    %50 = tpu.matmul %31, %40, %cst_28 {dimension_numbers = #tpu.dot_dimension_numbers<[2], [2], [1], [1], [0, 0, 0, 1, 1, 1], [0], [0]>} : vector<4x8x8xf32>, vector<4x8x8xf32>, vector<4x8x8xf32> -> vector<4x8x8xf32>
    "tpu.trace_stop"() : () -> ()
    %51 = arith.addf %50, %12 : vector<4x8x8xf32>
    %52 = vector.broadcast %14 : f32 to vector<4x8x8xf32>
    %53 = arith.mulf %51, %52 : vector<4x8x8xf32>
    %cst_29 = arith.constant dense<0xFF800000> : vector<4x8xf32>
    %54 = vector.multi_reduction <maximumf>, %53, %cst_29 [2] : vector<4x8x8xf32> to vector<4x8xf32>
    %55 = vector.shape_cast %54 : vector<4x8xf32> to vector<4x8x1xf32>
    %56 = vector.broadcast %55 : vector<4x8x1xf32> to vector<4x8x8xf32>
    %57 = arith.subf %53, %56 : vector<4x8x8xf32>
    %58 = math.exp %57 : vector<4x8x8xf32>
    %cst_30 = arith.constant dense<0.000000e+00> : vector<4x8xf32>
    %59 = vector.multi_reduction <add>, %58, %cst_30 [2] : vector<4x8x8xf32> to vector<4x8xf32>
    %60 = vector.shape_cast %59 : vector<4x8xf32> to vector<4x8x1xf32>
    %61 = tpu.reciprocal %60 {approx = true} : vector<4x8x1xf32> -> vector<4x8x1xf32>
    %62 = vector.broadcast %61 : vector<4x8x1xf32> to vector<4x8x8xf32>
    %63 = arith.mulf %58, %62 : vector<4x8x8xf32>
    "tpu.trace_start"() <{level = 10 : i32, message = "bqk,bkd->bqd"}> : () -> ()
    %cst_31 = arith.constant dense<0.000000e+00> : vector<4x8x8xf32>
    %64 = tpu.matmul %63, %49, %cst_31 {dimension_numbers = #tpu.dot_dimension_numbers<[2], [1], [1], [2], [0, 0, 0, 1, 1, 2], [0], [0]>} : vector<4x8x8xf32>, vector<4x8x8xf32>, vector<4x8x8xf32> -> vector<4x8x8xf32>
    "tpu.trace_stop"() : () -> ()
    %65 = vector.extract_strided_slice %64 {offsets = [0, 0, 0], sizes = [1, 8, 8], strides = [1, 1, 1]} : vector<4x8x8xf32> to vector<1x8x8xf32>
    %66 = vector.shape_cast %65 : vector<1x8x8xf32> to vector<8x8xf32>
    %67 = vector.extract_strided_slice %64 {offsets = [1, 0, 0], sizes = [1, 8, 8], strides = [1, 1, 1]} : vector<4x8x8xf32> to vector<1x8x8xf32>
    %68 = vector.shape_cast %67 : vector<1x8x8xf32> to vector<8x8xf32>
    %69 = vector.extract_strided_slice %64 {offsets = [2, 0, 0], sizes = [1, 8, 8], strides = [1, 1, 1]} : vector<4x8x8xf32> to vector<1x8x8xf32>
    %70 = vector.shape_cast %69 : vector<1x8x8xf32> to vector<8x8xf32>
    %71 = vector.extract_strided_slice %64 {offsets = [3, 0, 0], sizes = [1, 8, 8], strides = [1, 1, 1]} : vector<4x8x8xf32> to vector<1x8x8xf32>
    %72 = vector.shape_cast %71 : vector<1x8x8xf32> to vector<8x8xf32>
    %73 = tpu.concatenate %66, %68, %70, %72 in 1 : vector<8x8xf32>, vector<8x8xf32>, vector<8x8xf32>, vector<8x8xf32> -> vector<8x32xf32>
    %cst_32 = arith.constant dense<0.000000e+00> : vector<8x32xf32>
    %74 = tpu.matmul %73, %18, %cst_32 {dimension_numbers = #tpu.dot_dimension_numbers<[1], [0], [0], [1], [0, 0, 1, 1], [], []>} : vector<8x32xf32>, vector<32x32xf32>, vector<8x32xf32> -> vector<8x32xf32>
    %75 = vector.broadcast %19 : vector<1x32xf32> to vector<8x32xf32>
    %76 = arith.addf %74, %75 : vector<8x32xf32>
    %77 = arith.addf %76, %1 : vector<8x32xf32>
    %c0_33 = arith.constant 0 : index
    %c0_34 = arith.constant 0 : index
    %78 = vector.load %arg10[%c0_33, %c0_34] : memref<1x32xf32, #tpu.memory_space<vmem>>, vector<1x32xf32>
    %c0_35 = arith.constant 0 : index
    %c0_36 = arith.constant 0 : index
    %79 = vector.load %arg11[%c0_35, %c0_36] : memref<1x32xf32, #tpu.memory_space<vmem>>, vector<1x32xf32>
    %cst_37 = arith.constant dense<0.000000e+00> : vector<8xf32>
    %80 = vector.multi_reduction <add>, %77, %cst_37 [1] : vector<8x32xf32> to vector<8xf32>
    %81 = vector.shape_cast %80 : vector<8xf32> to vector<8x1xf32>
    %cst_38 = arith.constant 3.200000e+01 : f32
    %82 = vector.broadcast %cst_38 : f32 to vector<8x1xf32>
    %83 = arith.divf %81, %82 : vector<8x1xf32>
    %84 = vector.broadcast %83 : vector<8x1xf32> to vector<8x32xf32>
    %85 = arith.subf %77, %84 : vector<8x32xf32>
    %86 = arith.mulf %85, %85 : vector<8x32xf32>
    %cst_39 = arith.constant dense<0.000000e+00> : vector<8xf32>
    %87 = vector.multi_reduction <add>, %86, %cst_39 [1] : vector<8x32xf32> to vector<8xf32>
    %88 = vector.shape_cast %87 : vector<8xf32> to vector<8x1xf32>
    %cst_40 = arith.constant 3.200000e+01 : f32
    %89 = vector.broadcast %cst_40 : f32 to vector<8x1xf32>
    %90 = arith.divf %88, %89 : vector<8x1xf32>
    %91 = vector.broadcast %83 : vector<8x1xf32> to vector<8x32xf32>
    %92 = arith.subf %77, %91 : vector<8x32xf32>
    %cst_41 = arith.constant 9.99999974E-6 : f32
    %93 = vector.broadcast %cst_41 : f32 to vector<8x1xf32>
    %94 = arith.addf %90, %93 : vector<8x1xf32>
    %95 = math.rsqrt %94 : vector<8x1xf32>
    %96 = vector.broadcast %95 : vector<8x1xf32> to vector<8x32xf32>
    %97 = arith.mulf %92, %96 : vector<8x32xf32>
    %98 = vector.broadcast %78 : vector<1x32xf32> to vector<8x32xf32>
    %99 = arith.mulf %97, %98 : vector<8x32xf32>
    %100 = vector.broadcast %79 : vector<1x32xf32> to vector<8x32xf32>
    %101 = arith.addf %99, %100 : vector<8x32xf32>
    %c0_42 = arith.constant 0 : index
    %c0_43 = arith.constant 0 : index
    %102 = vector.load %arg14[%c0_42, %c0_43] : memref<32x32xf32, #tpu.memory_space<vmem>>, vector<32x32xf32>
    %c0_44 = arith.constant 0 : index
    %c0_45 = arith.constant 0 : index
    %103 = vector.load %arg13[%c0_44, %c0_45] : memref<32x32xf32, #tpu.memory_space<vmem>>, vector<32x32xf32>
    %c0_46 = arith.constant 0 : index
    %c0_47 = arith.constant 0 : index
    %104 = vector.load %arg12[%c0_46, %c0_47] : memref<32x32xf32, #tpu.memory_space<vmem>>, vector<32x32xf32>
    %c0_48 = arith.constant 0 : index
    %c0_49 = arith.constant 0 : index
    %105 = vector.load %arg15[%c0_48, %c0_49] : memref<32x32xf32, #tpu.memory_space<vmem>>, vector<32x32xf32>
    %c0_50 = arith.constant 0 : index
    %c0_51 = arith.constant 0 : index
    %106 = vector.load %arg16[%c0_50, %c0_51] : memref<1x32xf32, #tpu.memory_space<vmem>>, vector<1x32xf32>
    %cst_52 = arith.constant dense<0.000000e+00> : vector<8x32xf32>
    %107 = tpu.matmul %3, %102, %cst_52 {dimension_numbers = #tpu.dot_dimension_numbers<[1], [0], [0], [1], [0, 0, 1, 1], [], []>} : vector<8x32xf32>, vector<32x32xf32>, vector<8x32xf32> -> vector<8x32xf32>
    %cst_53 = arith.constant dense<0.000000e+00> : vector<8x32xf32>
    %108 = tpu.matmul %5, %103, %cst_53 {dimension_numbers = #tpu.dot_dimension_numbers<[1], [0], [0], [1], [0, 0, 1, 1], [], []>} : vector<8x32xf32>, vector<32x32xf32>, vector<8x32xf32> -> vector<8x32xf32>
    %cst_54 = arith.constant dense<0.000000e+00> : vector<8x32xf32>
    %109 = tpu.matmul %101, %104, %cst_54 {dimension_numbers = #tpu.dot_dimension_numbers<[1], [0], [0], [1], [0, 0, 1, 1], [], []>} : vector<8x32xf32>, vector<32x32xf32>, vector<8x32xf32> -> vector<8x32xf32>
    %110 = vector.extract_strided_slice %109 {offsets = [0, 0], sizes = [8, 8], strides = [1, 1]} : vector<8x32xf32> to vector<8x8xf32>
    %111 = vector.shape_cast %110 : vector<8x8xf32> to vector<1x8x8xf32>
    %112 = vector.extract_strided_slice %109 {offsets = [0, 8], sizes = [8, 8], strides = [1, 1]} : vector<8x32xf32> to vector<8x8xf32>
    %113 = vector.shape_cast %112 : vector<8x8xf32> to vector<1x8x8xf32>
    %114 = vector.extract_strided_slice %109 {offsets = [0, 16], sizes = [8, 8], strides = [1, 1]} : vector<8x32xf32> to vector<8x8xf32>
    %115 = vector.shape_cast %114 : vector<8x8xf32> to vector<1x8x8xf32>
    %116 = vector.extract_strided_slice %109 {offsets = [0, 24], sizes = [8, 8], strides = [1, 1]} : vector<8x32xf32> to vector<8x8xf32>
    %117 = vector.shape_cast %116 : vector<8x8xf32> to vector<1x8x8xf32>
    %118 = tpu.concatenate %111, %113, %115, %117 in 0 : vector<1x8x8xf32>, vector<1x8x8xf32>, vector<1x8x8xf32>, vector<1x8x8xf32> -> vector<4x8x8xf32>
    %119 = vector.extract_strided_slice %108 {offsets = [0, 0], sizes = [8, 8], strides = [1, 1]} : vector<8x32xf32> to vector<8x8xf32>
    %120 = vector.shape_cast %119 : vector<8x8xf32> to vector<1x8x8xf32>
    %121 = vector.extract_strided_slice %108 {offsets = [0, 8], sizes = [8, 8], strides = [1, 1]} : vector<8x32xf32> to vector<8x8xf32>
    %122 = vector.shape_cast %121 : vector<8x8xf32> to vector<1x8x8xf32>
    %123 = vector.extract_strided_slice %108 {offsets = [0, 16], sizes = [8, 8], strides = [1, 1]} : vector<8x32xf32> to vector<8x8xf32>
    %124 = vector.shape_cast %123 : vector<8x8xf32> to vector<1x8x8xf32>
    %125 = vector.extract_strided_slice %108 {offsets = [0, 24], sizes = [8, 8], strides = [1, 1]} : vector<8x32xf32> to vector<8x8xf32>
    %126 = vector.shape_cast %125 : vector<8x8xf32> to vector<1x8x8xf32>
    %127 = tpu.concatenate %120, %122, %124, %126 in 0 : vector<1x8x8xf32>, vector<1x8x8xf32>, vector<1x8x8xf32>, vector<1x8x8xf32> -> vector<4x8x8xf32>
    %128 = vector.extract_strided_slice %107 {offsets = [0, 0], sizes = [8, 8], strides = [1, 1]} : vector<8x32xf32> to vector<8x8xf32>
    %129 = vector.shape_cast %128 : vector<8x8xf32> to vector<1x8x8xf32>
    %130 = vector.extract_strided_slice %107 {offsets = [0, 8], sizes = [8, 8], strides = [1, 1]} : vector<8x32xf32> to vector<8x8xf32>
    %131 = vector.shape_cast %130 : vector<8x8xf32> to vector<1x8x8xf32>
    %132 = vector.extract_strided_slice %107 {offsets = [0, 16], sizes = [8, 8], strides = [1, 1]} : vector<8x32xf32> to vector<8x8xf32>
    %133 = vector.shape_cast %132 : vector<8x8xf32> to vector<1x8x8xf32>
    %134 = vector.extract_strided_slice %107 {offsets = [0, 24], sizes = [8, 8], strides = [1, 1]} : vector<8x32xf32> to vector<8x8xf32>
    %135 = vector.shape_cast %134 : vector<8x8xf32> to vector<1x8x8xf32>
    %136 = tpu.concatenate %129, %131, %133, %135 in 0 : vector<1x8x8xf32>, vector<1x8x8xf32>, vector<1x8x8xf32>, vector<1x8x8xf32> -> vector<4x8x8xf32>
    "tpu.trace_start"() <{level = 10 : i32, message = "bqd,bkd->bqk"}> : () -> ()
    %cst_55 = arith.constant dense<0.000000e+00> : vector<4x8x8xf32>
    %137 = tpu.matmul %118, %127, %cst_55 {dimension_numbers = #tpu.dot_dimension_numbers<[2], [2], [1], [1], [0, 0, 0, 1, 1, 1], [0], [0]>} : vector<4x8x8xf32>, vector<4x8x8xf32>, vector<4x8x8xf32> -> vector<4x8x8xf32>
    "tpu.trace_stop"() : () -> ()
    %138 = vector.broadcast %14 : f32 to vector<4x8x8xf32>
    %139 = arith.mulf %137, %138 : vector<4x8x8xf32>
    %cst_56 = arith.constant dense<0xFF800000> : vector<4x8xf32>
    %140 = vector.multi_reduction <maximumf>, %139, %cst_56 [2] : vector<4x8x8xf32> to vector<4x8xf32>
    %141 = vector.shape_cast %140 : vector<4x8xf32> to vector<4x8x1xf32>
    %142 = vector.broadcast %141 : vector<4x8x1xf32> to vector<4x8x8xf32>
    %143 = arith.subf %139, %142 : vector<4x8x8xf32>
    %144 = math.exp %143 : vector<4x8x8xf32>
    %cst_57 = arith.constant dense<0.000000e+00> : vector<4x8xf32>
    %145 = vector.multi_reduction <add>, %144, %cst_57 [2] : vector<4x8x8xf32> to vector<4x8xf32>
    %146 = vector.shape_cast %145 : vector<4x8xf32> to vector<4x8x1xf32>
    %147 = tpu.reciprocal %146 {approx = true} : vector<4x8x1xf32> -> vector<4x8x1xf32>
    %148 = vector.broadcast %147 : vector<4x8x1xf32> to vector<4x8x8xf32>
    %149 = arith.mulf %144, %148 : vector<4x8x8xf32>
    "tpu.trace_start"() <{level = 10 : i32, message = "bqk,bkd->bqd"}> : () -> ()
    %cst_58 = arith.constant dense<0.000000e+00> : vector<4x8x8xf32>
    %150 = tpu.matmul %149, %136, %cst_58 {dimension_numbers = #tpu.dot_dimension_numbers<[2], [1], [1], [2], [0, 0, 0, 1, 1, 2], [0], [0]>} : vector<4x8x8xf32>, vector<4x8x8xf32>, vector<4x8x8xf32> -> vector<4x8x8xf32>
    "tpu.trace_stop"() : () -> ()
    %151 = vector.extract_strided_slice %150 {offsets = [0, 0, 0], sizes = [1, 8, 8], strides = [1, 1, 1]} : vector<4x8x8xf32> to vector<1x8x8xf32>
    %152 = vector.shape_cast %151 : vector<1x8x8xf32> to vector<8x8xf32>
    %153 = vector.extract_strided_slice %150 {offsets = [1, 0, 0], sizes = [1, 8, 8], strides = [1, 1, 1]} : vector<4x8x8xf32> to vector<1x8x8xf32>
    %154 = vector.shape_cast %153 : vector<1x8x8xf32> to vector<8x8xf32>
    %155 = vector.extract_strided_slice %150 {offsets = [2, 0, 0], sizes = [1, 8, 8], strides = [1, 1, 1]} : vector<4x8x8xf32> to vector<1x8x8xf32>
    %156 = vector.shape_cast %155 : vector<1x8x8xf32> to vector<8x8xf32>
    %157 = vector.extract_strided_slice %150 {offsets = [3, 0, 0], sizes = [1, 8, 8], strides = [1, 1, 1]} : vector<4x8x8xf32> to vector<1x8x8xf32>
    %158 = vector.shape_cast %157 : vector<1x8x8xf32> to vector<8x8xf32>
    %159 = tpu.concatenate %152, %154, %156, %158 in 1 : vector<8x8xf32>, vector<8x8xf32>, vector<8x8xf32>, vector<8x8xf32> -> vector<8x32xf32>
    %cst_59 = arith.constant dense<0.000000e+00> : vector<8x32xf32>
    %160 = tpu.matmul %159, %105, %cst_59 {dimension_numbers = #tpu.dot_dimension_numbers<[1], [0], [0], [1], [0, 0, 1, 1], [], []>} : vector<8x32xf32>, vector<32x32xf32>, vector<8x32xf32> -> vector<8x32xf32>
    %161 = vector.broadcast %106 : vector<1x32xf32> to vector<8x32xf32>
    %162 = arith.addf %160, %161 : vector<8x32xf32>
    %163 = arith.addf %162, %101 : vector<8x32xf32>
    %c0_60 = arith.constant 0 : index
    %c0_61 = arith.constant 0 : index
    %164 = vector.load %arg17[%c0_60, %c0_61] : memref<1x32xf32, #tpu.memory_space<vmem>>, vector<1x32xf32>
    %c0_62 = arith.constant 0 : index
    %c0_63 = arith.constant 0 : index
    %165 = vector.load %arg18[%c0_62, %c0_63] : memref<1x32xf32, #tpu.memory_space<vmem>>, vector<1x32xf32>
    %cst_64 = arith.constant dense<0.000000e+00> : vector<8xf32>
    %166 = vector.multi_reduction <add>, %163, %cst_64 [1] : vector<8x32xf32> to vector<8xf32>
    %167 = vector.shape_cast %166 : vector<8xf32> to vector<8x1xf32>
    %cst_65 = arith.constant 3.200000e+01 : f32
    %168 = vector.broadcast %cst_65 : f32 to vector<8x1xf32>
    %169 = arith.divf %167, %168 : vector<8x1xf32>
    %170 = vector.broadcast %169 : vector<8x1xf32> to vector<8x32xf32>
    %171 = arith.subf %163, %170 : vector<8x32xf32>
    %172 = arith.mulf %171, %171 : vector<8x32xf32>
    %cst_66 = arith.constant dense<0.000000e+00> : vector<8xf32>
    %173 = vector.multi_reduction <add>, %172, %cst_66 [1] : vector<8x32xf32> to vector<8xf32>
    %174 = vector.shape_cast %173 : vector<8xf32> to vector<8x1xf32>
    %cst_67 = arith.constant 3.200000e+01 : f32
    %175 = vector.broadcast %cst_67 : f32 to vector<8x1xf32>
    %176 = arith.divf %174, %175 : vector<8x1xf32>
    %177 = vector.broadcast %169 : vector<8x1xf32> to vector<8x32xf32>
    %178 = arith.subf %163, %177 : vector<8x32xf32>
    %cst_68 = arith.constant 9.99999974E-6 : f32
    %179 = vector.broadcast %cst_68 : f32 to vector<8x1xf32>
    %180 = arith.addf %176, %179 : vector<8x1xf32>
    %181 = math.rsqrt %180 : vector<8x1xf32>
    %182 = vector.broadcast %181 : vector<8x1xf32> to vector<8x32xf32>
    %183 = arith.mulf %178, %182 : vector<8x32xf32>
    %184 = vector.broadcast %164 : vector<1x32xf32> to vector<8x32xf32>
    %185 = arith.mulf %183, %184 : vector<8x32xf32>
    %186 = vector.broadcast %165 : vector<1x32xf32> to vector<8x32xf32>
    %187 = arith.addf %185, %186 : vector<8x32xf32>
    %c0_69 = arith.constant 0 : index
    %c0_70 = arith.constant 0 : index
    %188 = vector.load %arg19[%c0_69, %c0_70] : memref<32x128xf32, #tpu.memory_space<vmem>>, vector<32x128xf32>
    %cst_71 = arith.constant dense<0.000000e+00> : vector<8x128xf32>
    %189 = tpu.matmul %187, %188, %cst_71 {dimension_numbers = #tpu.dot_dimension_numbers<[1], [0], [0], [1], [0, 0, 1, 1], [], []>} : vector<8x32xf32>, vector<32x128xf32>, vector<8x128xf32> -> vector<8x128xf32>
    %c0_72 = arith.constant 0 : index
    %c0_73 = arith.constant 0 : index
    %190 = vector.load %arg20[%c0_72, %c0_73] : memref<1x128xf32, #tpu.memory_space<vmem>>, vector<1x128xf32>
    %191 = vector.broadcast %190 : vector<1x128xf32> to vector<8x128xf32>
    %192 = arith.addf %189, %191 : vector<8x128xf32>
    %cst_74 = arith.constant 0.000000e+00 : f32
    %193 = vector.broadcast %cst_74 : f32 to vector<8x128xf32>
    %194 = arith.maximumf %192, %193 : vector<8x128xf32>
    %c0_75 = arith.constant 0 : index
    %c0_76 = arith.constant 0 : index
    %195 = vector.load %arg21[%c0_75, %c0_76] : memref<128x32xf32, #tpu.memory_space<vmem>>, vector<128x32xf32>
    %cst_77 = arith.constant dense<0.000000e+00> : vector<8x32xf32>
    %196 = tpu.matmul %194, %195, %cst_77 {dimension_numbers = #tpu.dot_dimension_numbers<[1], [0], [0], [1], [0, 0, 1, 1], [], []>} : vector<8x128xf32>, vector<128x32xf32>, vector<8x32xf32> -> vector<8x32xf32>
    %c0_78 = arith.constant 0 : index
    %c0_79 = arith.constant 0 : index
    %197 = vector.load %arg22[%c0_78, %c0_79] : memref<1x32xf32, #tpu.memory_space<vmem>>, vector<1x32xf32>
    %198 = vector.broadcast %197 : vector<1x32xf32> to vector<8x32xf32>
    %199 = arith.addf %196, %198 : vector<8x32xf32>
    %200 = arith.addf %199, %187 : vector<8x32xf32>
    %c0_80 = arith.constant 0 : index
    %c0_81 = arith.constant 0 : index
    %201 = vector.load %arg23[%c0_80, %c0_81] : memref<1x32xf32, #tpu.memory_space<vmem>>, vector<1x32xf32>
    %c0_82 = arith.constant 0 : index
    %c0_83 = arith.constant 0 : index
    %202 = vector.load %arg24[%c0_82, %c0_83] : memref<1x32xf32, #tpu.memory_space<vmem>>, vector<1x32xf32>
    %cst_84 = arith.constant dense<0.000000e+00> : vector<8xf32>
    %203 = vector.multi_reduction <add>, %200, %cst_84 [1] : vector<8x32xf32> to vector<8xf32>
    %204 = vector.shape_cast %203 : vector<8xf32> to vector<8x1xf32>
    %cst_85 = arith.constant 3.200000e+01 : f32
    %205 = vector.broadcast %cst_85 : f32 to vector<8x1xf32>
    %206 = arith.divf %204, %205 : vector<8x1xf32>
    %207 = vector.broadcast %206 : vector<8x1xf32> to vector<8x32xf32>
    %208 = arith.subf %200, %207 : vector<8x32xf32>
    %209 = arith.mulf %208, %208 : vector<8x32xf32>
    %cst_86 = arith.constant dense<0.000000e+00> : vector<8xf32>
    %210 = vector.multi_reduction <add>, %209, %cst_86 [1] : vector<8x32xf32> to vector<8xf32>
    %211 = vector.shape_cast %210 : vector<8xf32> to vector<8x1xf32>
    %cst_87 = arith.constant 3.200000e+01 : f32
    %212 = vector.broadcast %cst_87 : f32 to vector<8x1xf32>
    %213 = arith.divf %211, %212 : vector<8x1xf32>
    %214 = vector.broadcast %206 : vector<8x1xf32> to vector<8x32xf32>
    %215 = arith.subf %200, %214 : vector<8x32xf32>
    %cst_88 = arith.constant 9.99999974E-6 : f32
    %216 = vector.broadcast %cst_88 : f32 to vector<8x1xf32>
    %217 = arith.addf %213, %216 : vector<8x1xf32>
    %218 = math.rsqrt %217 : vector<8x1xf32>
    %219 = vector.broadcast %218 : vector<8x1xf32> to vector<8x32xf32>
    %220 = arith.mulf %215, %219 : vector<8x32xf32>
    %221 = vector.broadcast %201 : vector<1x32xf32> to vector<8x32xf32>
    %222 = arith.mulf %220, %221 : vector<8x32xf32>
    %223 = vector.broadcast %202 : vector<1x32xf32> to vector<8x32xf32>
    %224 = arith.addf %222, %223 : vector<8x32xf32>
    %225 = vector.shape_cast %224 : vector<8x32xf32> to vector<1x8x32xf32>
    %c0_89 = arith.constant 0 : index
    %c0_90 = arith.constant 0 : index
    %c0_91 = arith.constant 0 : index
    %226 = vector.load %arg25[%c0_89, %c0_90, %c0_91] : memref<1x8x32xf32, #tpu.memory_space<vmem>>, vector<1x8x32xf32>
    tpu.vector_store %arg25[%c0_89, %c0_90, %c0_91], %225 {strides = array<i32>} : memref<1x8x32xf32, #tpu.memory_space<vmem>>, vector<1x8x32xf32>,
    return
  }
  func.func @transform_0(%arg0: i32) -> (i32, i32, i32) {
    %c0_i32 = arith.constant 0 : i32
    %c0_i32_0 = arith.constant 0 : i32
    %c0_i32_1 = arith.constant 0 : i32
    return %arg0, %c0_i32, %c0_i32_0 : i32, i32, i32
  }
  func.func @transform_1(%arg0: i32) -> (i32, i32, i32) {
    %c0_i32 = arith.constant 0 : i32
    %c0_i32_0 = arith.constant 0 : i32
    %c0_i32_1 = arith.constant 0 : i32
    return %arg0, %c0_i32, %c0_i32_0 : i32, i32, i32
  }
  func.func @transform_2(%arg0: i32) -> (i32, i32, i32) {
    %c0_i32 = arith.constant 0 : i32
    %c0_i32_0 = arith.constant 0 : i32
    %c0_i32_1 = arith.constant 0 : i32
    return %arg0, %c0_i32, %c0_i32_0 : i32, i32, i32
  }
  func.func @transform_3(%arg0: i32) -> (i32, i32, i32) {
    %c0_i32 = arith.constant 0 : i32
    %c0_i32_0 = arith.constant 0 : i32
    %c0_i32_1 = arith.constant 0 : i32
    return %arg0, %c0_i32, %c0_i32_0 : i32, i32, i32
  }
  func.func @transform_4(%arg0: i32) -> (i32, i32) {
    %c0_i32 = arith.constant 0 : i32
    %c0_i32_0 = arith.constant 0 : i32
    %c0_i32_1 = arith.constant 0 : i32
    return %c0_i32, %c0_i32_0 : i32, i32
  }
  func.func @transform_5(%arg0: i32) -> (i32, i32) {
    %c0_i32 = arith.constant 0 : i32
    %c0_i32_0 = arith.constant 0 : i32
    %c0_i32_1 = arith.constant 0 : i32
    return %c0_i32, %c0_i32_0 : i32, i32
  }
  func.func @transform_6(%arg0: i32) -> (i32, i32) {
    %c0_i32 = arith.constant 0 : i32
    %c0_i32_0 = arith.constant 0 : i32
    %c0_i32_1 = arith.constant 0 : i32
    return %c0_i32, %c0_i32_0 : i32, i32
  }
  func.func @transform_7(%arg0: i32) -> (i32, i32) {
    %c0_i32 = arith.constant 0 : i32
    %c0_i32_0 = arith.constant 0 : i32
    %c0_i32_1 = arith.constant 0 : i32
    return %c0_i32, %c0_i32_0 : i32, i32
  }
  func.func @transform_8(%arg0: i32) -> (i32, i32) {
    %c0_i32 = arith.constant 0 : i32
    %c0_i32_0 = arith.constant 0 : i32
    %c0_i32_1 = arith.constant 0 : i32
    return %c0_i32, %c0_i32_0 : i32, i32
  }
  func.func @transform_9(%arg0: i32) -> (i32, i32) {
    %c0_i32 = arith.constant 0 : i32
    %c0_i32_0 = arith.constant 0 : i32
    %c0_i32_1 = arith.constant 0 : i32
    return %c0_i32, %c0_i32_0 : i32, i32
  }
  func.func @transform_10(%arg0: i32) -> (i32, i32) {
    %c0_i32 = arith.constant 0 : i32
    %c0_i32_0 = arith.constant 0 : i32
    %c0_i32_1 = arith.constant 0 : i32
    return %c0_i32, %c0_i32_0 : i32, i32
  }
  func.func @transform_11(%arg0: i32) -> (i32, i32) {
    %c0_i32 = arith.constant 0 : i32
    %c0_i32_0 = arith.constant 0 : i32
    %c0_i32_1 = arith.constant 0 : i32
    return %c0_i32, %c0_i32_0 : i32, i32
  }
  func.func @transform_12(%arg0: i32) -> (i32, i32) {
    %c0_i32 = arith.constant 0 : i32
    %c0_i32_0 = arith.constant 0 : i32
    %c0_i32_1 = arith.constant 0 : i32
    return %c0_i32, %c0_i32_0 : i32, i32
  }
  func.func @transform_13(%arg0: i32) -> (i32, i32) {
    %c0_i32 = arith.constant 0 : i32
    %c0_i32_0 = arith.constant 0 : i32
    %c0_i32_1 = arith.constant 0 : i32
    return %c0_i32, %c0_i32_0 : i32, i32
  }
  func.func @transform_14(%arg0: i32) -> (i32, i32) {
    %c0_i32 = arith.constant 0 : i32
    %c0_i32_0 = arith.constant 0 : i32
    %c0_i32_1 = arith.constant 0 : i32
    return %c0_i32, %c0_i32_0 : i32, i32
  }
  func.func @transform_15(%arg0: i32) -> (i32, i32) {
    %c0_i32 = arith.constant 0 : i32
    %c0_i32_0 = arith.constant 0 : i32
    %c0_i32_1 = arith.constant 0 : i32
    return %c0_i32, %c0_i32_0 : i32, i32
  }
  func.func @transform_16(%arg0: i32) -> (i32, i32) {
    %c0_i32 = arith.constant 0 : i32
    %c0_i32_0 = arith.constant 0 : i32
    %c0_i32_1 = arith.constant 0 : i32
    return %c0_i32, %c0_i32_0 : i32, i32
  }
  func.func @transform_17(%arg0: i32) -> (i32, i32) {
    %c0_i32 = arith.constant 0 : i32
    %c0_i32_0 = arith.constant 0 : i32
    %c0_i32_1 = arith.constant 0 : i32
    return %c0_i32, %c0_i32_0 : i32, i32
  }
  func.func @transform_18(%arg0: i32) -> (i32, i32) {
    %c0_i32 = arith.constant 0 : i32
    %c0_i32_0 = arith.constant 0 : i32
    %c0_i32_1 = arith.constant 0 : i32
    return %c0_i32, %c0_i32_0 : i32, i32
  }
  func.func @transform_19(%arg0: i32) -> (i32, i32) {
    %c0_i32 = arith.constant 0 : i32
    %c0_i32_0 = arith.constant 0 : i32
    %c0_i32_1 = arith.constant 0 : i32
    return %c0_i32, %c0_i32_0 : i32, i32
  }
  func.func @transform_20(%arg0: i32) -> (i32, i32) {
    %c0_i32 = arith.constant 0 : i32
    %c0_i32_0 = arith.constant 0 : i32
    %c0_i32_1 = arith.constant 0 : i32
    return %c0_i32, %c0_i32_0 : i32, i32
  }
  func.func @transform_21(%arg0: i32) -> (i32, i32) {
    %c0_i32 = arith.constant 0 : i32
    %c0_i32_0 = arith.constant 0 : i32
    %c0_i32_1 = arith.constant 0 : i32
    return %c0_i32, %c0_i32_0 : i32, i32
  }
  func.func @transform_22(%arg0: i32) -> (i32, i32) {
    %c0_i32 = arith.constant 0 : i32
    %c0_i32_0 = arith.constant 0 : i32
    %c0_i32_1 = arith.constant 0 : i32
    return %c0_i32, %c0_i32_0 : i32, i32
  }
  func.func @transform_23(%arg0: i32) -> (i32, i32) {
    %c0_i32 = arith.constant 0 : i32
    %c0_i32_0 = arith.constant 0 : i32
    %c0_i32_1 = arith.constant 0 : i32
    return %c0_i32, %c0_i32_0 : i32, i32
  }
  func.func @transform_24(%arg0: i32) -> (i32, i32, i32) {
    %c0_i32 = arith.constant 0 : i32
    %c0_i32_0 = arith.constant 0 : i32
    %c0_i32_1 = arith.constant 0 : i32
    return %arg0, %c0_i32, %c0_i32_0 : i32, i32, i32
  }
}

</mosaic_0001>

<bundles_post_ra>
// kernel: tpu_custom_call.1
= control target key start
LH: loop header
LB: loop body
LE: loop exit
PB: predicated region body
PF: predicated region fallthrough
CT: control target
= control target key end

     0   :  { %s5608_s0 = inlined_call_operand.hbm [shape: f32[2,8,8], index: 0, kind: input, shape index: {}]   ;;  %s5609_s1 = inlined_call_operand.hbm [shape: f32[2,8,32], index: 1, kind: input, shape index: {}]   ;;  %s5610_s2 = inlined_call_operand.hbm [shape: f32[2,8,32], index: 2, kind: input, shape index: {}]   ;;  %s5611_s3 = inlined_call_operand.hbm [shape: f32[2,8,32], index: 3, kind: input, shape index: {}]   ;;  %s5612_s4 = inlined_call_operand.vmem [shape: f32[32,32], index: 4, kind: input, shape index: {}]   ;;  %s5613_s5 = inlined_call_operand.vmem [shape: f32[32,32], index: 5, kind: input, shape index: {}]   ;;  %s5614_s6 = inlined_call_operand.vmem [shape: f32[32,32], index: 6, kind: input, shape index: {}]   ;;  %s5615_s7 = inlined_call_operand.vmem [shape: f32[32,32], index: 7, kind: input, shape index: {}]   ;;  %s5616_s8 = inlined_call_operand.hbm [shape: f32[1,32], index: 8, kind: input, shape index: {}]   ;;  %s5617_s9 = inlined_call_operand.hbm [shape: f32[1,32], index: 9, kind: input, shape index: {}]   ;;  %s5618_s10 = inlined_call_operand.hbm [shape: f32[1,32], index: 10, kind: input, shape index: {}]   ;;  %s5619_s11 = inlined_call_operand.vmem [shape: f32[32,32], index: 11, kind: input, shape index: {}]   ;;  %s5620_s12 = inlined_call_operand.vmem [shape: f32[32,32], index: 12, kind: input, shape index: {}]   ;;  %s5621_s13 = inlined_call_operand.hbm [shape: f32[32,32], index: 13, kind: input, shape index: {}]   ;;  %s5622_s14 = inlined_call_operand.hbm [shape: f32[32,32], index: 14, kind: input, shape index: {}]   ;;  %s5623_s15 = inlined_call_operand.hbm [shape: f32[1,32], index: 15, kind: input, shape index: {}]   ;;  %s5624_s16 = inlined_call_operand.hbm [shape: f32[1,32], index: 16, kind: input, shape index: {}]   ;;  %s5625_s17 = inlined_call_operand.hbm [shape: f32[1,32], index: 17, kind: input, shape index: {}]   ;;  %s5626_s18 = inlined_call_operand.hbm [shape: f32[32,128], index: 18, kind: input, shape index: {}]   ;;  %s5627_s19 = inlined_call_operand.vmem [shape: f32[1,128], index: 19, kind: input, shape index: {}]   ;;  %s5628_s20 = inlined_call_operand.vmem [shape: f32[128,32], index: 20, kind: input, shape index: {}]   ;;  %s5629_s21 = inlined_call_operand.vmem [shape: f32[1,32], index: 21, kind: input, shape index: {}]   ;;  %s5630_s22 = inlined_call_operand.vmem [shape: f32[1,32], index: 22, kind: input, shape index: {}]   ;;  %s5631_s23 = inlined_call_operand.vmem [shape: f32[1,32], index: 23, kind: input, shape index: {}]   ;;  %s5632_s24 = inlined_call_operand.hbm [shape: f32[2,8,32], index: 24, kind: output, shape index: {}]  }
   0x1   :  { %5675 = sst [smem:[#allocation37_spill]] %s5608_s0 }
   0x2   :  { %5676 = sst [smem:[#allocation38_spill]] %s5609_s1 }
   0x3   :  { %5677 = sst [smem:[#allocation39_spill]] %s5610_s2 }
   0x4   :  { %5678 = sst [smem:[#allocation40_spill]] %s5611_s3 }
   0x5   :  { %5679 = sst [smem:[#allocation41_spill]] %s5612_s4 }
   0x6   :  { %5680 = sst [smem:[#allocation42_spill]] %s5613_s5 }
   0x7   :  { %5681 = sst [smem:[#allocation43_spill]] %s5614_s6 }
   0x8   :  { %5682 = sst [smem:[#allocation44_spill]] %s5615_s7 }
   0x9   :  { %5683 = sst [smem:[#allocation45_spill]] %s5616_s8 }
   0xa   :  { %5684 = sst [smem:[#allocation46_spill]] %s5617_s9 }
   0xb   :  { %5685 = sst [smem:[#allocation47_spill]] %s5618_s10 }
   0xc   :  { %5686 = sst [smem:[#allocation48_spill]] %s5619_s11 }
   0xd   :  { %5687 = sst [smem:[#allocation49_spill]] %s5620_s12 }
   0xe   :  { %5688 = sst [smem:[#allocation50_spill]] %s5621_s13 }
   0xf   :  { %5689 = sst [smem:[#allocation51_spill]] %s5623_s15 }
  0x10   :  { %5690 = sst [smem:[#allocation52_spill]] %s5625_s17 }
  0x11   :  { %5691 = sst [smem:[#allocation53_spill]] %s5627_s19 }
  0x12   :  { %5692 = sst [smem:[#allocation54_spill]] %s5628_s20 }
  0x13   :  { %5693 = sst [smem:[#allocation55_spill]] %s5629_s21 }
  0x14   :  { %5694 = sst [smem:[#allocation56_spill]] %s5630_s22 }
  0x15   :  { %5695 = sst [smem:[#allocation57_spill]] %s5631_s23 }
  0x16   :  { %5696 = sst [smem:[#allocation58_spill]] %s5632_s24 }
  0x17   :  { %29 = vsyncpa [#allocation3], 0 }
  0x18   :  { %31 = vsyncpa [#allocation3 + $0x1], 0 }
  0x19   :  { %32 = vsyncpa [#allocation6], 0 }
  0x1a   :  { %34 = vsyncpa [#allocation6 + $0x1], 0 }
  0x1b   :  { %35 = vsyncpa [#allocation9], 0 }
  0x1c   :  { %37 = vsyncpa [#allocation9 + $0x1], 0 }
  0x1d   :  { %38 = vsyncpa [#allocation12], 0 }
  0x1e   :  { %39 = vsyncpa [#allocation15], 0 }
  0x1f   :  { %40 = vsyncpa [#allocation18], 0 }
  0x20   :  { %41 = vsyncpa [#allocation21], 0 }
  0x21   :  { %42 = vsyncpa [#allocation4], 0 }
  0x22   :  { %44 = vsyncpa [#allocation4 + $0x1], 0  ;;  %s4755_s5 = smov 0   ;;  %s4757_s26 = smov 0  }
  0x23   :  { %s4759_s27 = smov 0   ;;  %s4761_s28 = smov 0  }
  0x24 LB: > { %5697 = sst [smem:[#allocation33_spill]] %s4591_s5  ;;  %s4605_s6 = smov [#allocation10]   ;;  %s4603_s28 = sphi %s4761_s28, %s5762_s28   ;;  %s4599_s27 = sphi %s4759_s27, %s5766_s27   ;;  %s4595_s26 = sphi %s4757_s26, %s5765_s26   ;;  %s4591_s5 = sphi %s4755_s5, %s5764_s5  }
  0x25   : > { %s630_s2 = sshll.u32 %s4605_s6, 4  ;;  %s4776_s29 = sadd.s32 4294967295, %s4603_s28   ;;  %s4781_s2 = int_to_ptr.vmem [resolvable:$true] %s630_s2 }
  0x26   : > { %p3469_p0 = scmp.ge.s32.totalorder %s4603_s28, 1  ;;  %p5647_p1 = scmp.eq.s32.totalorder %s4776_s29, 0 }
  0x27   : > { %p605_p2 = scmp.lt.s32.totalorder %s4603_s28, 3  ;;  %s4606_s7 = smov [#allocation11]  }
  0x28   : > { %s641_s30 = sshll.u32 %s4606_s7, 4  ;;  %s4607_s3 = smov [#allocation14]   ;;  %s4790_s30 = int_to_ptr.vmem [resolvable:$true] %s641_s30 }
  0x29   : > { %p4783_p3 = pnand %p3469_p0, %p605_p2  ;;  %s668_s25 = sshll.u32 %s4607_s3, 4  ;;  %s4798_s25 = int_to_ptr.vmem [resolvable:$true] %s668_s25 }
  0x2a   : > { %s5700_s6 = sld [smem:[#allocation45_spill]] }
  0x2b   : > { %s5698_s0 = scalar_select %p4783_p3, 1, 0 }
  0x2c   : > { %p3982_p5 = pneg %p4783_p3 }
  0x2e   : > { %p4794_p6 = pnand %p3982_p5, %p5647_p1 }
  0x30   : > { %s5699_s8 = scalar_select %p4794_p6, 1, 0 }
  0x31   : > { %s4137_s24 = scalar_lea.hbm %s5700_s6, 16  ;;  %p4808_p8 = pneg %p4794_p6 }
  0x32   : > { %p4138_p7 = scmp.ne.s32.totalorder %s5700_s6, %s4137_s24  ;;  %p4144_p11 = scmp.lt.u32.totalorder %s4137_s24, %s5700_s6 }
  0x33   : > { %s5701_s7 = scalar_select %p4808_p8, 1, 0 }
  0x34   : > { %p4140_p9 = pnand %p4808_p8, %p4138_p7 }
  0x36   : > { %p4141_p10 = pneg %p4140_p9 }
  0x38   : > { %p4146_p12 = pnand %p4144_p11, %p4141_p10 }
  0x3a   : > { %4149 = shalt.err (!%p4146_p12)
}
  0x3b   : > { %s4150_s22 = scalar_lea.vmem %s4781_s2, 16  ;;  %s4157_s23 = scalar_lea.vmem %s4781_s2, 32 }
  0x3c   : > { %p4151_p13 = scmp.ne.s32.totalorder %s4781_s2, %s4150_s22  ;;  %p4158_p5 = scmp.lt.s32.totalorder %s4781_s2, %s4781_s2 }
  0x3d   : > { %p4159_p7 = scmp.lt.s32.totalorder %s4157_s23, %s4150_s22 }
  0x3e   : > { %p4153_p0 = pnand %p4151_p13, %p4808_p8 }
  0x3f   : > { %p4160_p9 = por %p4159_p7, %p4158_p5 }
  0x40   : > { %p4154_p2 = pneg %p4153_p0 }
  0x42   : > { %p4161_p4 = pnand %p4160_p9, %p4154_p2 }
  0x44   : > { %4164 = shalt.err (!%p4161_p4)
}
  0x45   : > { %3985 = dma.hbm_to_vmem [thread:$0]  (!%p4794_p6), %s5700_s6, 16, %s4781_s2, [#allocation9]  }
  0x46   : > { %s5702_s9 = sld [smem:[#allocation46_spill]] }
  0x4c   : > { %s4165_s3 = scalar_lea.hbm %s5702_s9, 16 }
  0x4d   : > { %p4166_p10 = scmp.ne.s32.totalorder %s5702_s9, %s4165_s3  ;;  %p4172_p4 = scmp.lt.u32.totalorder %s4165_s3, %s5702_s9 }
  0x4f   : > { %p4168_p11 = pnand %p4166_p10, %p4808_p8 }
  0x51   : > { %p4169_p12 = pneg %p4168_p11 }
  0x53   : > { %p4174_p13 = pnand %p4172_p4, %p4169_p12 }
  0x55   : > { %4177 = shalt.err (!%p4174_p13)
}
  0x56   : > { %s4178_s2 = scalar_lea.vmem %s4790_s30, 16  ;;  %s4185_s19 = scalar_lea.vmem %s4790_s30, 32 }
  0x57   : > { %p4179_p0 = scmp.ne.s32.totalorder %s4790_s30, %s4178_s2  ;;  %p4186_p7 = scmp.lt.s32.totalorder %s4790_s30, %s4790_s30 }
  0x58   : > { %p4187_p9 = scmp.lt.s32.totalorder %s4185_s19, %s4178_s2 }
  0x59   : > { %p4181_p2 = pnand %p4179_p0, %p4808_p8 }
  0x5a   : > { %p4188_p10 = por %p4187_p9, %p4186_p7 }
  0x5b   : > { %p4182_p5 = pneg %p4181_p2 }
  0x5d   : > { %p4189_p11 = pnand %p4188_p10, %p4182_p5 }
  0x5f   : > { %4192 = shalt.err (!%p4189_p11)
}
  0x60   : > { %3988 = dma.hbm_to_vmem [thread:$0]  (!%p4794_p6), %s5702_s9, 16, %s4790_s30, [#allocation12]  }
  0x61   : > { %s5703_s13 = sld [smem:[#allocation50_spill]] }
  0x67   : > { %s4193_s1 = scalar_lea.hbm %s5703_s13, 512 }
  0x68   : > { %p4194_p12 = scmp.ne.s32.totalorder %s5703_s13, %s4193_s1  ;;  %p4200_p0 = scmp.lt.u32.totalorder %s4193_s1, %s5703_s13 }
  0x6a   : > { %p4196_p4 = pnand %p4194_p12, %p4808_p8 }
  0x6c   : > { %p4197_p13 = pneg %p4196_p4 }
  0x6e   : > { %p4202_p2 = pnand %p4200_p0, %p4197_p13 }
  0x70   : > { %4205 = shalt.err (!%p4202_p2)
}
  0x71   : > { %s4206_s30 = scalar_lea.vmem %s4798_s25, 512  ;;  %p4214_p10 = scmp.lt.s32.totalorder %s4798_s25, %s4798_s25 }
  0x72   : > { %p4207_p5 = scmp.ne.s32.totalorder %s4798_s25, %s4206_s30  ;;  %p4215_p11 = scmp.lt.s32.totalorder %s4206_s30, %s4206_s30 }
  0x74   : > { %p4209_p7 = pnand %p4207_p5, %p4808_p8  ;;  %p4216_p12 = por %p4215_p11, %p4214_p10 }
  0x76   : > { %p4210_p9 = pneg %p4209_p7 }
  0x78   : > { %p4217_p4 = pnand %p4216_p12, %p4210_p9 }
  0x7a   : > { %4220 = shalt.err (!%p4217_p4)
}
  0x7b   : > { %s5650_s19 = smov 128   ;;  %s5652_s20 = smov 8  }
  0x7c   : > { %3994 = dma.hbm_to_vmem [thread:$0]  (!%p4794_p6), %s5703_s13, 512, %s4798_s25, [#allocation15], %s5650_s19, %s5650_s19, %s5652_s20  }
  0x7d   : > { %s4610_s4 = smov [#allocation17]   ;;  %s4611_s3 = smov [#allocation20]  }
  0x7e   : > { %s695_s1 = sshll.u32 %s4610_s4, 4  ;;  %s717_s22 = sshll.u32 %s4611_s3, 4  ;;  %s696_s1 = int_to_ptr.vmem [resolvable:$true] %s695_s1  ;;  %s718_s22 = int_to_ptr.vmem [resolvable:$true] %s717_s22 }
  0x7f   : > { %s5704_s15 = sld [smem:[#allocation51_spill]] }
  0x85   : > { %s4221_s30 = scalar_lea.hbm %s5704_s15, 16 }
  0x86   : > { %p4222_p13 = scmp.ne.s32.totalorder %s5704_s15, %s4221_s30  ;;  %p4228_p5 = scmp.lt.u32.totalorder %s4221_s30, %s5704_s15 }
  0x88   : > { %p4224_p0 = pnand %p4222_p13, %p4808_p8 }
  0x8a   : > { %p4225_p2 = pneg %p4224_p0 }
  0x8c   : > { %p4230_p7 = pnand %p4228_p5, %p4225_p2 }
  0x8e   : > { %4233 = shalt.err (!%p4230_p7)
}
  0x8f   : > { %s4234_s25 = scalar_lea.vmem %s696_s1, 16  ;;  %s4241_s21 = scalar_lea.vmem %s696_s1, 32 }
  0x90   : > { %p4235_p9 = scmp.ne.s32.totalorder %s696_s1, %s4234_s25  ;;  %p4242_p12 = scmp.lt.s32.totalorder %s696_s1, %s696_s1 }
  0x91   : > { %p4243_p4 = scmp.lt.s32.totalorder %s4241_s21, %s4234_s25 }
  0x92   : > { %p4237_p10 = pnand %p4235_p9, %p4808_p8 }
  0x93   : > { %p4244_p1 = por %p4243_p4, %p4242_p12 }
  0x94   : > { %p4238_p11 = pneg %p4237_p10 }
  0x96   : > { %p4245_p3 = pnand %p4244_p1, %p4238_p11 }
  0x98   : > { %4248 = shalt.err (!%p4245_p3)
}
  0x99   : > { %4000 = dma.hbm_to_vmem [thread:$0]  (!%p4794_p6), %s5704_s15, 16, %s696_s1, [#allocation18]  }
  0x9a   : > { %s5705_s17 = sld [smem:[#allocation52_spill]] }
  0xa0   : > { %s4249_s24 = scalar_lea.hbm %s5705_s17, 16 }
  0xa1   : > { %p4250_p13 = scmp.ne.s32.totalorder %s5705_s17, %s4249_s24  ;;  %p4256_p3 = scmp.lt.u32.totalorder %s4249_s24, %s5705_s17 }
  0xa3   : > { %p4252_p0 = pnand %p4250_p13, %p4808_p8 }
  0xa5   : > { %p4253_p1 = pneg %p4252_p0 }
  0xa7   : > { %p4258_p2 = pnand %p4256_p3, %p4253_p1 }
  0xa9   : > { %4261 = shalt.err (!%p4258_p2)
}
  0xaa   : > { %s4262_s30 = scalar_lea.vmem %s718_s22, 16  ;;  %s4269_s1 = scalar_lea.vmem %s718_s22, 32 }
  0xab   : > { %p4263_p5 = scmp.ne.s32.totalorder %s718_s22, %s4262_s30  ;;  %p4270_p10 = scmp.lt.s32.totalorder %s718_s22, %s718_s22 }
  0xac   : > { %p4271_p11 = scmp.lt.s32.totalorder %s4269_s1, %s4262_s30 }
  0xad   : > { %p4265_p7 = pnand %p4263_p5, %p4808_p8 }
  0xae   : > { %p4272_p12 = por %p4271_p11, %p4270_p10 }
  0xaf   : > { %p4266_p9 = pneg %p4265_p7 }
  0xb1   : > { %p4273_p4 = pnand %p4272_p12, %p4266_p9 }
  0xb3   : > { %4276 = shalt.err (!%p4273_p4)
}
  0xb4   : > { %4006 = dma.hbm_to_vmem [thread:$0]  (!%p4794_p6), %s5705_s17, 16, %s718_s22, [#allocation21]  }
  0xb5   : > { %s3468_s9 = sadd.s32 4294967294, %s4603_s28   ;;  %s4918_s6 = sadd.s32 1, %s4603_s28  }
  0xb6   : > { %5706 = sst [smem:[#allocation34_spill]] %s4918_s6  ;;  %s57_s11 = sadd.s32 1, %s4599_s27 }
  0xb7   : > { %s54_s12 = ssub.s32 %s4603_s28, %s4918_s6  ;;  %p64_p13 = scmp.ne.s32.totalorder %s4599_s27, %s4595_s26 }
  0xb8   : > { %p55_p0 = scmp.eq.s32.totalorder %s54_s12, 0  ;;  %p65_p1 = scmp.eq.s32.totalorder %s4603_s28, 0 }
  0xb9   : > { %p70_p3 = scmp.ne.s32.totalorder %s4595_s26, %s4591_s5  ;;  %p592_p2 = scmp.eq.s32.totalorder %s4776_s29, 1 }
  0xba   : > { %s4930_s24 = scalar_select %p55_p0, %s4599_s27, %s57_s11  }
  0xbb   : > { %p66_p5 = por %p65_p1, %p64_p13  ;;  %p5708_p7 = scmp.eq.s32.totalorder %s4776_s29, 0 }
  0xbc   : > { %5707 = sst [smem:[#allocation35_spill]] %s4930_s24  ;;  %p4938_p10 = por %p592_p2, %p64_p13 }
  0xbd   : > { %p4934_p9 = por %p5708_p7, %p70_p3  ;;  %p598_p11 = scmp.eq.s32.totalorder %s3468_s9, 1 }
  0xbe   : > { %s5710_s4 = scalar_select %p4938_p10, 1, 0 }
  0xbf   : > { %s5709_s22 = scalar_select %p4934_p9, 1, 0 }
  0xc0   : > { %p4036_p12 = scmp.lt.s32.totalorder %s4603_s28, 2  ;;  %s5649_s3 = sand.u32 1, %s4599_s27  }
  0xc1   : > { %p4944_p4 = por %p598_p11, %p70_p3  ;;  %s4950_s2 = sshll.u32 %s5649_s3, 3 }
  0xc2   : > { %s4953_s30 = sshll.u32 %s4603_s28, 7  ;;  %p4955_p0 = pnand %p4036_p12, %p66_p5 }
  0xc3   : > { %s5711_s23 = scalar_select %p4944_p4, 1, 0 }
  0xc4   : > { %s5713_s1 = scalar_select %p4955_p0, 1, 0 }
  0xc5   : > { %5712 = sst [smem:[#allocation36_spill]] %s5711_s23  ;;  %s5655_s25 = sand.u32 1, %s4603_s28  }
  0xc6   : > { %s5714_s11 = sld [smem:[#allocation38_spill]]  ;;  %s778_s3 = scalar_lea.vmem [#allocation5], %s4950_s2 }
  0xc7   : > { %s785_s19 = sshll.u32 %s778_s3, 4  ;;  %s4971_s20 = scalar_lea.sflag [#allocation6], %s5655_s25  ;;  %s4967_s19 = int_to_ptr.vmem [resolvable:$true] %s785_s19 }
  0xc8   : > { %p4977_p1 = pneg %p4955_p0 }
  0xca   : > { %s5715_s15 = scalar_select %p4977_p1, 1, 0 }
  0xcc   : > { %s4964_s12 = scalar_lea.hbm %s5714_s11, %s4953_s30  ;;  %s4282_s3 = scalar_lea.hbm %s5714_s11, 256 }
  0xcd   : > { %s4277_s13 = scalar_lea.hbm %s4964_s12, 128  ;;  %p4283_p5 = scmp.lt.u32.totalorder %s4964_s12, %s5714_s11 }
  0xce   : > { %p4278_p13 = scmp.ne.s32.totalorder %s4964_s12, %s4277_s13  ;;  %p4284_p7 = scmp.lt.u32.totalorder %s4282_s3, %s4277_s13 }
  0xcf   : > { %p4286_p12 = scmp.lt.u32.totalorder %s4277_s13, %s4964_s12 }
  0xd0   : > { %p4280_p3 = pnand %p4977_p1, %p4278_p13  ;;  %p4285_p11 = por %p4284_p7, %p4283_p5 }
  0xd2   : > { %p4281_p2 = pneg %p4280_p3  ;;  %p4287_p4 = por %p4286_p12, %p4285_p11 }
  0xd4   : > { %p4288_p10 = pnand %p4287_p4, %p4281_p2 }
  0xd6   : > { %4291 = shalt.err (!%p4288_p10)
}
  0xd7   : > { %s4292_s25 = scalar_lea.vmem %s4967_s19, 128  ;;  %s4612_s21 = smov [#allocation5]  }
  0xd8   : > { %p4293_p13 = scmp.ne.s32.totalorder %s4967_s19, %s4292_s25  ;;  %s4297_s9 = sshll.u32 %s4612_s21, 4  ;;  %s4298_s9 = int_to_ptr.vmem [resolvable:$false] %s4297_s9 }
  0xd9   : > { %s4299_s17 = scalar_lea.vmem %s4298_s9, 256  ;;  %p4300_p6 = scmp.lt.s32.totalorder %s4967_s19, %s4298_s9 }
  0xda   : > { %p4295_p3 = pnand %p4293_p13, %p4977_p1  ;;  %p4301_p8 = scmp.lt.s32.totalorder %s4299_s17, %s4292_s25 }
  0xdc   : > { %p4296_p9 = pneg %p4295_p3  ;;  %p4302_p5 = por %p4301_p8, %p4300_p6 }
  0xde   : > { %p4303_p7 = pnand %p4302_p5, %p4296_p9 }
  0xe0   : > { %4306 = shalt.err (!%p4303_p7)
}
  0xe1   : > { %4016 = dma.hbm_to_vmem [thread:$0]  (!%p4955_p0), %s4964_s12, 128, %s4967_s19, %s4971_s20  }
  0xe2   : > { %s4613_s13 = smov [#allocation13]   ;;  %s4614_s3 = smov [#allocation16]  }
  0xe3   : > { %s652_s24 = sshll.u32 %s4613_s13, 4  ;;  %s681_s11 = sshll.u32 %s4614_s3, 4  ;;  %s653_s24 = int_to_ptr.vmem [resolvable:$true] %s652_s24  ;;  %s5001_s11 = int_to_ptr.vmem [resolvable:$true] %s681_s11 }
  0xe4   : > { %s5716_s10 = sld [smem:[#allocation47_spill]]  ;;  %p5717_p8 = scmp.ne.s32.totalorder %s5701_s7, 0 }
  0xea   : > { %s4307_s25 = scalar_lea.hbm %s5716_s10, 16 }
  0xeb   : > { %p4308_p6 = scmp.ne.s32.totalorder %s5716_s10, %s4307_s25  ;;  %p4314_p4 = scmp.lt.u32.totalorder %s4307_s25, %s5716_s10 }
  0xed   : > { %p4310_p9 = pnand %p4308_p6, %p5717_p8 }
  0xef   : > { %p4311_p10 = pneg %p4310_p9 }
  0xf1   : > { %p4316_p2 = pnand %p4314_p4, %p4311_p10 }
  0xf3   : > { %4319 = shalt.err (!%p4316_p2)
}
  0xf4   : > { %s4320_s12 = scalar_lea.vmem %s653_s24, 16  ;;  %s4327_s13 = scalar_lea.vmem %s653_s24, 32 }
  0xf5   : > { %p4321_p11 = scmp.ne.s32.totalorder %s653_s24, %s4320_s12  ;;  %p4328_p3 = scmp.lt.s32.totalorder %s653_s24, %s653_s24 }
  0xf6   : > { %p4329_p5 = scmp.lt.s32.totalorder %s4327_s13, %s4320_s12 }
  0xf7   : > { %p4323_p12 = pnand %p4321_p11, %p5717_p8 }
  0xf8   : > { %p4330_p7 = por %p4329_p5, %p4328_p3 }
  0xf9   : > { %p4324_p13 = pneg %p4323_p12 }
  0xfb   : > { %p4331_p0 = pnand %p4330_p7, %p4324_p13 }
  0xfd   : > { %4334 = shalt.err (!%p4331_p0)
}
  0xfe   : > { %p5718_p6 = scmp.ne.s32.totalorder %s5699_s8, 0  ;;  %s4335_s9 = scalar_lea.hbm %s5622_s14, 512 }
  0xff   : > { %p4336_p9 = scmp.ne.s32.totalorder %s5622_s14, %s4335_s9  ;;  %p4342_p0 = scmp.lt.u32.totalorder %s4335_s9, %s5622_s14 }
 0x100   : > { %3991 = dma.hbm_to_vmem [thread:$0]  (!%p5718_p6), %s5716_s10, 16, %s653_s24, [#allocation12]  }
 0x101   : > { %p4338_p10 = pnand %p4336_p9, %p5717_p8 }
 0x103   : > { %p4339_p4 = pneg %p4338_p10 }
 0x105   : > { %p4344_p2 = pnand %p4342_p0, %p4339_p4 }
 0x107   : > { %4347 = shalt.err (!%p4344_p2)
}
 0x108   : > { %s4348_s24 = scalar_lea.vmem %s5001_s11, 512  ;;  %p4356_p3 = scmp.lt.s32.totalorder %s5001_s11, %s5001_s11 }
 0x109   : > { %p4349_p11 = scmp.ne.s32.totalorder %s5001_s11, %s4348_s24  ;;  %p4357_p5 = scmp.lt.s32.totalorder %s4348_s24, %s4348_s24 }
 0x10b   : > { %p4351_p12 = pnand %p4349_p11, %p5717_p8  ;;  %p4358_p7 = por %p4357_p5, %p4356_p3 }
 0x10d   : > { %p4352_p13 = pneg %p4351_p12 }
 0x10f   : > { %p4359_p9 = pnand %p4358_p7, %p4352_p13 }
 0x111   : > { %4362 = shalt.err (!%p4359_p9)
}
 0x112   : > { %s5719_s13 = smov 8   ;;  %s5720_s6 = smov 128  }
 0x113   : > { %3997 = dma.hbm_to_vmem [thread:$0]  (!%p5718_p6), %s5622_s14, 512, %s5001_s11, [#allocation15], %s5720_s6, %s5720_s6, %s5719_s13  }
 0x114   : > { %s4615_s21 = smov [#allocation19]   ;;  %s4616_s25 = smov [#allocation22]  }
 0x115   : > { %s706_s9 = sshll.u32 %s4615_s21, 4  ;;  %s727_s17 = sshll.u32 %s4616_s25, 4  ;;  %s707_s9 = int_to_ptr.vmem [resolvable:$true] %s706_s9  ;;  %s5047_s17 = int_to_ptr.vmem [resolvable:$true] %s727_s17 }
 0x116   : > { %s4363_s24 = scalar_lea.hbm %s5624_s16, 16 }
 0x117   : > { %p4364_p10 = scmp.ne.s32.totalorder %s5624_s16, %s4363_s24  ;;  %p4370_p2 = scmp.lt.u32.totalorder %s4363_s24, %s5624_s16 }
 0x119   : > { %p4366_p4 = pnand %p4364_p10, %p5717_p8 }
 0x11b   : > { %p4367_p0 = pneg %p4366_p4 }
 0x11d   : > { %p4372_p11 = pnand %p4370_p2, %p4367_p0 }
 0x11f   : > { %4375 = shalt.err (!%p4372_p11)
}
 0x120   : > { %s4376_s23 = scalar_lea.vmem %s707_s9, 16  ;;  %s4383_s21 = scalar_lea.vmem %s707_s9, 32 }
 0x121   : > { %p4377_p12 = scmp.ne.s32.totalorder %s707_s9, %s4376_s23  ;;  %p4384_p5 = scmp.lt.s32.totalorder %s707_s9, %s707_s9 }
 0x122   : > { %p4385_p7 = scmp.lt.s32.totalorder %s4383_s21, %s4376_s23 }
 0x123   : > { %p4379_p13 = pnand %p4377_p12, %p5717_p8 }
 0x124   : > { %p4386_p9 = por %p4385_p7, %p4384_p5 }
 0x125   : > { %p4380_p3 = pneg %p4379_p13 }
 0x127   : > { %p4387_p1 = pnand %p4386_p9, %p4380_p3 }
 0x129   : > { %4390 = shalt.err (!%p4387_p1)
}
 0x12a   : > { %4003 = dma.hbm_to_vmem [thread:$0]  (!%p5718_p6), %s5624_s16, 16, %s707_s9, [#allocation18]  }
 0x12b   : > { %s4391_s12 = scalar_lea.hbm %s5626_s18, 512 }
 0x12c   : > { %p4392_p10 = scmp.ne.s32.totalorder %s5626_s18, %s4391_s12  ;;  %p4398_p1 = scmp.lt.u32.totalorder %s4391_s12, %s5626_s18 }
 0x12e   : > { %p4394_p4 = pnand %p4392_p10, %p5717_p8 }
 0x130   : > { %p4395_p0 = pneg %p4394_p4 }
 0x132   : > { %p4400_p2 = pnand %p4398_p1, %p4395_p0 }
 0x134   : > { %4403 = shalt.err (!%p4400_p2)
}
 0x135   : > { %s4404_s9 = scalar_lea.vmem %s5047_s17, 512  ;;  %p4412_p3 = scmp.lt.s32.totalorder %s5047_s17, %s5047_s17 }
 0x136   : > { %p4405_p11 = scmp.ne.s32.totalorder %s5047_s17, %s4404_s9  ;;  %p4413_p5 = scmp.lt.s32.totalorder %s4404_s9, %s4404_s9 }
 0x138   : > { %p4407_p12 = pnand %p4405_p11, %p5717_p8  ;;  %p4414_p7 = por %p4413_p5, %p4412_p3 }
 0x13a   : > { %p4408_p13 = pneg %p4407_p12 }
 0x13c   : > { %p4415_p9 = pnand %p4414_p7, %p4408_p13 }
 0x13e   : > { %4418 = shalt.err (!%p4415_p9)
}
 0x13f   : > { %4009 = dma.hbm_to_vmem [thread:$0]  (!%p5718_p6), %s5626_s18, 512, %s5047_s17, [#allocation21], %s5720_s6, %s5720_s6, %s5719_s13  }
 0x140   : > { %s5721_s25 = sld [smem:[#allocation37_spill]]  ;;  %s760_s8 = scalar_lea.vmem [#allocation2], %s4950_s2 }
 0x141   : > { %s767_s12 = sshll.u32 %s760_s8, 4  ;;  %s5722_s24 = sand.u32 1, %s4599_s27   ;;  %s768_s12 = int_to_ptr.vmem [resolvable:$true] %s767_s12 }
 0x142   : > { %s757_s3 = scalar_lea.sflag [#allocation3], %s5722_s24  ;;  %p5723_p10 = scmp.ne.s32.totalorder %s5715_s15, 0 }
 0x146   : > { %s5097_s19 = scalar_lea.hbm %s5721_s25, %s4953_s30  ;;  %s4424_s17 = scalar_lea.hbm %s5721_s25, 256 }
 0x147   : > { %s4419_s11 = scalar_lea.hbm %s5097_s19, 128  ;;  %p4425_p6 = scmp.lt.u32.totalorder %s5097_s19, %s5721_s25 }
 0x148   : > { %p4420_p8 = scmp.ne.s32.totalorder %s5097_s19, %s4419_s11  ;;  %p4426_p1 = scmp.lt.u32.totalorder %s4424_s17, %s4419_s11 }
 0x149   : > { %p4428_p11 = scmp.lt.u32.totalorder %s4419_s11, %s5097_s19 }
 0x14a   : > { %p4422_p4 = pnand %p4420_p8, %p5723_p10  ;;  %p4427_p2 = por %p4426_p1, %p4425_p6 }
 0x14c   : > { %p4423_p0 = pneg %p4422_p4  ;;  %p4429_p12 = por %p4428_p11, %p4427_p2 }
 0x14e   : > { %p4430_p13 = pnand %p4429_p12, %p4423_p0 }
 0x150   : > { %4433 = shalt.err (!%p4430_p13)
}
 0x151   : > { %s4434_s21 = scalar_lea.vmem %s768_s12, 128  ;;  %s4617_s10 = smov [#allocation2]  }
 0x152   : > { %p4435_p3 = scmp.ne.s32.totalorder %s768_s12, %s4434_s21  ;;  %s4439_s7 = sshll.u32 %s4617_s10, 4  ;;  %s4440_s7 = int_to_ptr.vmem [resolvable:$false] %s4439_s7 }
 0x153   : > { %s4441_s5 = scalar_lea.vmem %s4440_s7, 256  ;;  %p4442_p9 = scmp.lt.s32.totalorder %s768_s12, %s4440_s7 }
 0x154   : > { %p4437_p5 = pnand %p4435_p3, %p5723_p10  ;;  %p4443_p8 = scmp.lt.s32.totalorder %s4441_s5, %s4434_s21 }
 0x156   : > { %p4438_p7 = pneg %p4437_p5  ;;  %p4444_p4 = por %p4443_p8, %p4442_p9 }
 0x158   : > { %p4445_p1 = pnand %p4444_p4, %p4438_p7 }
 0x15a   : > { %4448 = shalt.err (!%p4445_p1)
}
 0x15b   : > { %p5724_p6 = scmp.ne.s32.totalorder %s5713_s1, 0  ;;  %s5725_s11 = sld [smem:[#allocation39_spill]] }
 0x15c   : > { %s796_s6 = scalar_lea.vmem [#allocation7], %s4950_s2 }
 0x15d   : > { %4013 = dma.hbm_to_vmem [thread:$0]  (!%p5724_p6), %s5097_s19, 128, %s768_s12, %s757_s3  }
 0x15e   : > { %s803_s17 = sshll.u32 %s796_s6, 4  ;;  %s804_s17 = int_to_ptr.vmem [resolvable:$true] %s803_s17 }
 0x161   : > { %s5123_s13 = scalar_lea.hbm %s5725_s11, %s4953_s30  ;;  %s4454_s19 = scalar_lea.hbm %s5725_s11, 256 }
 0x162   : > { %s4449_s23 = scalar_lea.hbm %s5123_s13, 128  ;;  %p4455_p12 = scmp.lt.u32.totalorder %s5123_s13, %s5725_s11 }
 0x163   : > { %p4450_p0 = scmp.ne.s32.totalorder %s5123_s13, %s4449_s23  ;;  %p4456_p13 = scmp.lt.u32.totalorder %s4454_s19, %s4449_s23 }
 0x164   : > { %p4458_p5 = scmp.lt.u32.totalorder %s4449_s23, %s5123_s13 }
 0x165   : > { %p4452_p2 = pnand %p4450_p0, %p5723_p10  ;;  %p4457_p3 = por %p4456_p13, %p4455_p12 }
 0x167   : > { %p4453_p11 = pneg %p4452_p2  ;;  %p4459_p7 = por %p4458_p5, %p4457_p3 }
 0x169   : > { %p4460_p9 = pnand %p4459_p7, %p4453_p11 }
 0x16b   : > { %4463 = shalt.err (!%p4460_p9)
}
 0x16c   : > { %s4464_s10 = scalar_lea.vmem %s804_s17, 128  ;;  %s4618_s7 = smov [#allocation7]  }
 0x16d   : > { %p4465_p8 = scmp.ne.s32.totalorder %s804_s17, %s4464_s10  ;;  %s4469_s5 = sshll.u32 %s4618_s7, 4  ;;  %s4470_s5 = int_to_ptr.vmem [resolvable:$false] %s4469_s5 }
 0x16e   : > { %s4471_s8 = scalar_lea.vmem %s4470_s5, 256  ;;  %p4472_p0 = scmp.lt.s32.totalorder %s804_s17, %s4470_s5 }
 0x16f   : > { %p4467_p4 = pnand %p4465_p8, %p5723_p10  ;;  %p4473_p2 = scmp.lt.s32.totalorder %s4471_s8, %s4464_s10 }
 0x171   : > { %p4468_p1 = pneg %p4467_p4  ;;  %p4474_p6 = por %p4473_p2, %p4472_p0 }
 0x173   : > { %p4475_p12 = pnand %p4474_p6, %p4468_p1 }
 0x175   : > { %4478 = shalt.err (!%p4475_p12)
}
 0x176   : > { %p5726_p13 = scmp.ne.s32.totalorder %s5713_s1, 0  ;;  %s5727_s23 = sld [smem:[#allocation40_spill]] }
 0x177   : > { %s814_s21 = scalar_lea.vmem [#allocation8], %s4950_s2  ;;  %s5728_s12 = sand.u32 1, %s4603_s28  }
 0x178   : > { %4019 = dma.hbm_to_vmem [thread:$0]  (!%p5726_p13), %s5123_s13, 128, %s804_s17, %s4971_s20  }
 0x179   : > { %s821_s19 = sshll.u32 %s814_s21, 4  ;;  %s811_s3 = scalar_lea.sflag [#allocation9], %s5728_s12  ;;  %s822_s19 = int_to_ptr.vmem [resolvable:$true] %s821_s19 }
 0x17c   : > { %s5148_s9 = scalar_lea.hbm %s5727_s23, %s4953_s30  ;;  %s4484_s17 = scalar_lea.hbm %s5727_s23, 256 }
 0x17d   : > { %s4479_s10 = scalar_lea.hbm %s5148_s9, 128  ;;  %p4485_p5 = scmp.lt.u32.totalorder %s5148_s9, %s5727_s23 }
 0x17e   : > { %p4480_p6 = scmp.ne.s32.totalorder %s5148_s9, %s4479_s10  ;;  %p4486_p7 = scmp.lt.u32.totalorder %s4484_s17, %s4479_s10 }
 0x17f   : > { %p4488_p8 = scmp.lt.u32.totalorder %s4479_s10, %s5148_s9 }
 0x180   : > { %p4482_p11 = pnand %p4480_p6, %p5723_p10  ;;  %p4487_p9 = por %p4486_p7, %p4485_p5 }
 0x182   : > { %p4483_p3 = pneg %p4482_p11  ;;  %p4489_p4 = por %p4488_p8, %p4487_p9 }
 0x184   : > { %p4490_p1 = pnand %p4489_p4, %p4483_p3 }
 0x186   : > { %4493 = shalt.err (!%p4490_p1)
}
 0x187   : > { %s4494_s2 = scalar_lea.vmem %s822_s19, 128  ;;  %s4619_s5 = smov [#allocation8]  }
 0x188   : > { %p4495_p0 = scmp.ne.s32.totalorder %s822_s19, %s4494_s2  ;;  %s4499_s8 = sshll.u32 %s4619_s5, 4  ;;  %s4500_s8 = int_to_ptr.vmem [resolvable:$false] %s4499_s8 }
 0x189   : > { %s4501_s24 = scalar_lea.vmem %s4500_s8, 256  ;;  %p4502_p6 = scmp.lt.s32.totalorder %s822_s19, %s4500_s8 }
 0x18a   : > { %p4497_p2 = pnand %p4495_p0, %p5723_p10  ;;  %p4503_p11 = scmp.lt.s32.totalorder %s4501_s24, %s4494_s2 }
 0x18c   : > { %p4498_p12 = pneg %p4497_p2  ;;  %p4504_p13 = por %p4503_p11, %p4502_p6 }
 0x18e   : > { %p4505_p5 = pnand %p4504_p13, %p4498_p12 }
 0x190   : > { %4508 = shalt.err (!%p4505_p5)
}
 0x191   : > { %p5729_p7 = scmp.ne.s32.totalorder %s5713_s1, 0  ;;  %p5730_p3 = scmp.ne.s32.totalorder %s5698_s0, 0 }
 0x192   : > { %s5173_s15 = sand.u32 (!%p5730_p3), 1, %s4595_s26   ;;  %p5731_p10 = scmp.ne.s32.totalorder (!%p5730_p3), %s5709_s22, 0 }
 0x193   : > { %4022 = dma.hbm_to_vmem [thread:$0]  (!%p5729_p7), %s5148_s9, 128, %s822_s19, %s811_s3  }
 0x194   : > { %830 = sbr.rel (%p5730_p3) target bundleno = 4666 (0x123a), region = 116  ;;  %s5176_s6 = sshll.u32 (!%p5730_p3), %s5173_s15, 3 }
 0x195   : > { %s833_s21 = scalar_lea.sflag (!%p5730_p3), [#allocation3], %s5173_s15  ;;  %s836_s12 = scalar_lea.vmem (!%p5730_p3), [#allocation2], %s5176_s6 }
 0x19b   : > { %4554 = dma.done.wait (%p5731_p10), %s833_s21, 128  }
 0x19c   : > { %4556 = vsyncadd (%p5731_p10), %s833_s21, 4294967168  ;;  %s841_s0 = sand.u32 1, %s4776_s29   ;;  %s845_s9 = scalar_lea.vmem [#allocation5], %s5176_s6 }
 0x19d   : > { %s842_s1 = scalar_lea.sflag [#allocation6], %s841_s0 }
 0x19e   : > { %4558 = dma.done.wait (%p5731_p10), %s842_s1, 256  }
 0x19f   : > { %4560 = vsyncadd (%p5731_p10), %s842_s1, 4294967040  ;;  %s854_s19 = scalar_lea.vmem [#allocation7], %s5176_s6  ;;  %s860_s3 = scalar_lea.sflag [#allocation9], %s841_s0 }
 0x1a0   : > { %s863_s10 = scalar_lea.vmem [#allocation8], %s5176_s6 }
 0x1a1   : > { %4562 = dma.done.wait (%p5731_p10), %s860_s3, 128  }
 0x1a2   : > { %4564 = vsyncadd (%p5731_p10), %s860_s3, 4294967168  ;;  %p5732_p13 = scmp.eq.s32.totalorder %s4776_s29, 0 }
 0x1a4   : > { %4566 = dma.done.wait (%p5732_p13), [#allocation9], 16   ;;  %p5733_p9 = pmov %p5732_p13 }
 0x1a6   : > { %4568 = vsyncadd (%p5733_p9), [#allocation9], 4294967280  ;;  %p5734_p8 = pmov %p5733_p9 }
 0x1a8   : > { %4570 = dma.done.wait (%p5734_p8), [#allocation12], 32   ;;  %p5735_p4 = pmov %p5734_p8 }
 0x1aa   : > { %4572 = vsyncadd (%p5735_p4), [#allocation12], 4294967264  ;;  %p5736_p1 = pmov %p5735_p4 }
 0x1ac   : > { %4574 = dma.done.wait (%p5736_p1), [#allocation15], 1024   ;;  %p5737_p0 = pmov %p5736_p1 }
 0x1ae   : > { %4576 = vsyncadd (%p5737_p0), [#allocation15], 4294966272  ;;  %p5738_p2 = pmov %p5737_p0 }
 0x1af   : > { %p5739_p12 = pmov %p5737_p0 }
 0x1b0   : > { %4578 = dma.done.wait (%p5738_p2), [#allocation18], 32  }
 0x1b1   : > { %4580 = vsyncadd (%p5739_p12), [#allocation18], 4294967264  ;;  %p5740_p6 = pmov %p5737_p0 }
 0x1b2   : > { %p5741_p11 = pmov %p5737_p0 }
 0x1b3   : > { %4582 = dma.done.wait (%p5740_p6), [#allocation21], 528  }
 0x1b4   : > { %4584 = vsyncadd (%p5741_p11), [#allocation21], 4294966768  ;;  %v4620_v0 = vmov 0.0|0.0   ;;  %vm4621_vm0 = vmmov 0   ;;  %v4622_v1 = vmov 0.0   ;;  %s5742_s13 = sld [smem:[#allocation43_spill]] }
 0x1b5   : > { %3858 = vmatprep.subr.bf16.mxu1 %v4620_v0  ;;  %3652 = vmatprep.mubr.msk.f32.mxu1 %vm4621_vm0, %v4622_v1  ;;  %s5743_s0 = sld [smem:[#allocation42_spill]]  ;;  %v5243_v10 = vld [vmem:[%s845_s9] sm:$0xff]  ;;  %vm1002_vm1 = vcmask 261120   ;;  %s5744_s2 = sld [smem:[#allocation41_spill]]  ;;  %vm1240_vm2 = vcmask 64512   ;;  %v982_v33 = vld [vmem:[%s836_s12] sm:$0xff] }
 0x1b6   : > { %3687 = vmatprep.subr.mxu0 %v4622_v1  ;;  %3689 = vmatprep.mubr.msk.f32.mxu0 %vm4621_vm0, %v4622_v1  ;;  %s4623_s22 = smov 112   ;;  %s4624_s20 = smov 120   ;;  %vm983_vm3 = vcmp.eq.f32.partialorder %v982_v33, 0.0  ;;  %vm1890_vm4 = vcmask 130048   ;;  %vm1892_vm5 = vcmask 195584  }
 0x1b7   : > { %s4625_s17 = smov 104   ;;  %v984_v34 = vsel %vm983_vm3, -1e+20, %v4622_v1  ;;  %s5745_s9 = sld [smem:[#allocation44_spill]] }
 0x1b8   : > { %s5671_s3 = smov 8   ;;  %s5672_s12 = smov 16  }
 0x1b9   : > { %s5670_s30 = smov 24   ;;  %s5746_s8 = sld [smem:[#allocation49_spill]] }
 0x1ba   : > { %v985_v2 = vld [vmem:[%s5742_s13] sm:$0xff]  ;;  %v986_v3 = vld [vmem:[%s5742_s13 + $0x8] sm:$0xff]  ;;  %v987_v4 = vld [vmem:[%s5742_s13 + $0x10] sm:$0xff]  ;;  %s5754_s1 = sld [smem:[#allocation56_spill]]  ;;  %s3234_s24 = scalar_lea.sflag [#allocation4], %s5173_s15 }
 0x1bb   : > { %v3859_v5 = vpack.c.bf16 %v986_v3, %v985_v2  ;;  %v988_v6 = vld [vmem:[%s5742_s13 + $0x18] sm:$0xff]  ;;  %v989_v8 = vld [vmem:[%s5743_s0] sm:$0xff]  ;;  %v990_v9 = vld [vmem:[%s5743_s0 + $0x8] sm:$0xff]  ;;  %p5757_p7 = scmp.ne.s32.totalorder %s5710_s4, 0 }
 0x1bc   : > { %v3862_v7 = vpack.c.bf16 %v988_v6, %v987_v4  ;;  %v3865_v11 = vpack.c.bf16 %v990_v9, %v989_v8  ;;  %v991_v12 = vld [vmem:[%s5743_s0 + $0x10] sm:$0xff]  ;;  %v992_v13 = vld [vmem:[%s5743_s0 + $0x18] sm:$0xff]  ;;  %v993_v15 = vld [vmem:[%s5744_s2] sm:$0xff]  ;;  %s5756_s0 = sld [smem:[#allocation58_spill]] }
 0x1bd   : > { %3860 = vmatpush3.bf16.msra.mxu1 %v3859_v5  ;;  %v3868_v14 = vpack.c.bf16 %v992_v13, %v991_v12  ;;  %v994_v16 = vld [vmem:[%s5744_s2 + $0x8] sm:$0xff]  ;;  %v995_v18 = vld [vmem:[%s5744_s2 + $0x10] sm:$0xff]  ;;  %v996_v19 = vld [vmem:[%s5744_s2 + $0x18] sm:$0xff] }
 0x1be   : > { %3861 = vmatprep.subr.bf16.mxu1 %v4620_v0  ;;  %v3871_v17 = vpack.c.bf16 %v994_v16, %v993_v15  ;;  %v3874_v20 = vpack.c.bf16 %v996_v19, %v995_v18 }
 0x1c1   : > { %3863 = vmatpush3.bf16.msra.mxu1 %v3862_v7 }
 0x1c2   : > { %3864 = vmatprep.subr.bf16.mxu1 %v4620_v0 }
 0x1c4   : > { %3653 = vmatmul.mubr.msk.f32.vlgmr.msra.gmra.mrb[0].mxu1 %vm1002_vm1, %v5243_v10 }
 0x1c5   : > { %3866 = vmatpush3.bf16.msra.mxu1 %v3865_v11  ;;  %3663 = vmatprep.mubr.msk.f32.mxu1 %vm4621_vm0, %v4622_v1 }
 0x1c6   : > { %3867 = vmatprep.subr.bf16.mxu1 %v4620_v0 }
 0x1c9   : > { %3869 = vmatpush3.bf16.msra.mxu1 %v3868_v14 }
 0x1ca   : > { %3870 = vmatprep.subr.bf16.mxu1 %v4620_v0 }
 0x1cc   : > { %3664 = vmatmul.mubr.msk.f32.vlgmr.msra.gmra.mrb[2].mxu1 %vm1002_vm1, %v5243_v10 }
 0x1cd   : > { %3872 = vmatpush3.bf16.msra.mxu1 %v3871_v17  ;;  %3674 = vmatprep.mubr.msk.f32.mxu1 %vm4621_vm0, %v4622_v1 }
 0x1ce   : > { %3873 = vmatprep.subr.bf16.mxu1 %v4620_v0 }
 0x1d1   : > { %3875 = vmatpush3.bf16.msra.mxu1 %v3874_v20 }
 0x1d2   : > { %3677 = vmatprep.subr.mxu1 %v4622_v1 }
 0x1d4   : > { %3675 = vmatmul.mubr.msk.f32.vlgmr.msra.gmra.mrb[4].mxu1 %vm1002_vm1, %v5243_v10 }
 0x1d5   : > { %3679 = vmatprep.mubr.msk.f32.mxu1 %vm4621_vm0, %v4622_v1 }
 0x297   : > { %v5280_v21 = vpop.f32.mrb[0].mxu1 }
 0x298   : > { %v3654_v22 = vpop.f32.mrb[1].mxu1 }
 0x29f   : > { %v1142_v23 = vpop.f32.mrb[2].mxu1 }
 0x2a0   : > { %1226 = vrot.lane.b32.xlu1 %v1142_v23, %s4623_s22  ;;  %v3665_v24 = vpop.f32.mrb[3].mxu1  ;;  %1224 = vrot.lane.b32.xlu0 %v1142_v23, %s4624_s20 }
 0x2a1   : > { %3678 = vmatpush3.xpose.msk.msra.mxu1 %vm1240_vm2, %v1142_v23 }
 0x2a2   : > { %3682 = vmatprep.subr.mxu1 %v4622_v1 }
 0x2a4   : > { %1228 = vrot.lane.b32.xlu1 %v1142_v23, %s4625_s17 }
 0x2a7   : > { %v1212_v25 = vpop.f32.mrb[4].mxu1 }
 0x2a8   : > { %1221 = vrot.lane.b32.xlu1 %v1212_v25, %s4625_s17  ;;  %1217 = vrot.lane.b32.xlu0 %v1212_v25, %s4624_s20  ;;  %v3676_v26 = vpop.f32.mrb[5].mxu1 }
 0x2a9   : > { %3680 = vmatmul.mubr.msk.f32.vlgmr.msra.gmra.mrb[6].mxu1 %vm1240_vm2, %v1212_v25 }
 0x2aa   : > { %3684 = vmatprep.mubr.msk.f32.mxu1 %vm4621_vm0, %v4622_v1 }
 0x2ac   : > { %1219 = vrot.lane.b32.xlu0 %v1212_v25, %s4623_s22 }
 0x312   : > { %v1227_v27 = vpop.permute.xlu1 %1226  ;;  %v1225_v28 = vpop.permute.xlu0 %1224 }
 0x313   : > { %3683 = vmatpush3.xpose.msk.msra.mxu1 %vm1240_vm2, %v1225_v28  ;;  %3688 = vmatpush3.xpose.msk.msra.mxu0 %vm1240_vm2, %v1227_v27 }
 0x314   : > { %3692 = vmatprep.subr.mxu1 %v4622_v1  ;;  %3697 = vmatprep.subr.mxu0 %v4622_v1 }
 0x316   : > { %v1229_v29 = vpop.permute.xlu1 %1228 }
 0x31a   : > { %v1218_v30 = vpop.permute.xlu0 %1217  ;;  %v1222_v31 = vpop.permute.xlu1 %1221 }
 0x31b   : > { %3685 = vmatmul.mubr.msk.f32.vlgmr.msra.gmra.mrb[8].mxu1 %vm1240_vm2, %v1218_v30 }
 0x31c   : > { %3693 = vmatpush3.xpose.msk.msra.mxu1 %vm1240_vm2, %v1229_v29  ;;  %3694 = vmatprep.mubr.msk.f32.mxu1 %vm4621_vm0, %v4622_v1 }
 0x31d   : > { %3702 = vmatprep.subr.mxu1 %v4622_v1 }
 0x31e   : > { %v1220_v32 = vpop.permute.xlu0 %1219 }
 0x31f   : > { %3690 = vmatmul.mubr.msk.f32.vlgmr.msra.gmra.mrb[0].mxu0 %vm1240_vm2, %v1220_v32  ;;  %3695 = vmatmul.mubr.msk.f32.vlgmr.msra.gmra.mrb[10].mxu1 %vm1240_vm2, %v1222_v31  ;;  %v997_v31 = vld [vmem:[%s5745_s9] sm:$0xff]  ;;  %v998_v32 = vld [vmem:[%s5745_s9 + $0x8] sm:$0xff] }
 0x320   : > { %3698 = vmatpush3.msra.mxu0 %v5280_v21  ;;  %3699 = vmatprep.mubr.msk.f32.mxu0 %vm4621_vm0, %v4622_v1  ;;  %v3877_v33 = vpack.c.bf16 %v998_v32, %v997_v31 }
 0x321   : > { %3707 = vmatprep.subr.mxu0 %v4622_v1  ;;  %3704 = vmatprep.mubr.msk.f32.mxu1 %vm4621_vm0, %v4622_v1 }
 0x37c   : > { %v1311_v35 = vpop.f32.mrb[6].mxu1 }
 0x37d   : > { %v1312_v36 = vadd.f32 %v1311_v35, %v984_v34  ;;  %v3681_v37 = vpop.f32.mrb[7].mxu1  ;;  %v1000_v35 = vld [vmem:[%s5745_s9 + $0x18] sm:$0xff] }
 0x37f   : > { %v1537_v38 = vmul.f32 0.17677669, %v1312_v36 }
 0x381   : > { %v1541_v39 = vsel %vm1240_vm2, %v1537_v38, -inf }
 0x382   : > { %1542 = vmax.xlane.f32.xlu0 %v1541_v39 }
 0x3ee   : > { %v1385_v40 = vpop.f32.mrb[8].mxu1 }
 0x3ef   : > { %v1386_v41 = vadd.f32 %v1385_v40, %v984_v34  ;;  %v3686_v42 = vpop.f32.mrb[9].mxu1 }
 0x3f1   : > { %v1538_v43 = vmul.f32 0.17677669, %v1386_v41 }
 0x3f2   : > { %v1459_v44 = vpop.f32.mrb[0].mxu0  ;;  %v1533_v45 = vpop.f32.mrb[10].mxu1 }
 0x3f3   : > { %v1460_v46 = vadd.f32 %v1459_v44, %v984_v34  ;;  %v1534_v47 = vadd.f32 %v1533_v45, %v984_v34  ;;  %v3691_v48 = vpop.f32.mrb[1].mxu0  ;;  %v3696_v49 = vpop.f32.mrb[11].mxu1  ;;  %v1544_v50 = vsel %vm1240_vm2, %v1538_v43, -inf  ;;  %v999_v34 = vld [vmem:[%s5745_s9 + $0x10] sm:$0xff] }
 0x3f4   : > { %1545 = vmax.xlane.f32.xlu1 %v1544_v50  ;;  %v3880_v36 = vpack.c.bf16 %v1000_v35, %v999_v34  ;;  %v3518_v49 = vld [vmem:[#allocation10] ss:$0 sm:$0xff] }
 0x3f5   : > { %v1539_v51 = vmul.f32 0.17677669, %v1460_v46  ;;  %v1540_v52 = vmul.f32 0.17677669, %v1534_v47 }
 0x3f7   : > { %v1547_v53 = vsel %vm1240_vm2, %v1539_v51, -inf  ;;  %v1550_v54 = vsel %vm1240_vm2, %v1540_v52, -inf }
 0x3f8   : > { %1548 = vmax.xlane.f32.xlu0 %v1547_v53 }
 0x3fc   : > { %1551 = vmax.xlane.f32.xlu0 %v1550_v54 }
 0x405   : > { %1231 = vrot.lane.b32.xlu1 %v5280_v21, %s4624_s20 }
 0x40f   : > { %v1543_v55 = vpop.xlane.xlu0 %1542 }
 0x410   : > { %v1553_v56 = vsub.f32 %v1537_v38, %v1543_v55 }
 0x412   : > { %v1557_v57 = vmul.f32 1.442695, %v1553_v56 }
 0x414   : > { %4099 = vpow2.f32 %v1557_v57 }
 0x41e   : > { %v4100_v58 = vpop.eup %4099 }
 0x41f   : > { %v1565_v59 = vsel %vm1240_vm2, %v4100_v58, 0.0 }
 0x429   : > { %1566 = vadd.xlane.f32.xlu1 %v1565_v59 }
 0x481   : > { %v1546_v60 = vpop.xlane.xlu1 %1545 }
 0x482   : > { %v1554_v61 = vsub.f32 %v1538_v43, %v1546_v60  ;;  %v2008_v60 = vld [vmem:[%s5746_s8] sm:$0xff] }
 0x484   : > { %v1559_v62 = vmul.f32 1.442695, %v1554_v61  ;;  %v2009_v61 = vld [vmem:[%s5746_s8 + $0x8] sm:$0xff] }
 0x485   : > { %v1549_v63 = vpop.xlane.xlu0 %1548  ;;  %v1232_v2 = vpop.permute.xlu1 %1231 }
 0x486   : > { %4101 = vpow2.f32 %v1559_v62  ;;  %v1555_v3 = vsub.f32 %v1539_v51, %v1549_v63  ;;  %3703 = vmatpush3.msra.mxu1 %v1232_v2  ;;  %v2004_v62 = vld [vmem:[#allocation14] sm:$0xff]  ;;  %v2005_v63 = vld [vmem:[#allocation14 + $0x8] sm:$0xff] }
 0x487   : > { %3712 = vmatprep.subr.mxu1 %v4622_v1  ;;  %v2010_v2 = vld [vmem:[%s5746_s8 + $0x10] sm:$0xff] }
 0x488   : > { %v1561_v4 = vmul.f32 1.442695, %v1555_v3  ;;  %v3883_v3 = vpack.c.bf16 %v2005_v63, %v2004_v62 }
 0x489   : > { %v1552_v5 = vpop.xlane.xlu0 %1551 }
 0x48a   : > { %4103 = vpow2.f32 %v1561_v4  ;;  %v1556_v6 = vsub.f32 %v1540_v52, %v1552_v5  ;;  %v2011_v4 = vld [vmem:[%s5746_s8 + $0x18] sm:$0xff] }
 0x48b   : > { %v3892_v5 = vpack.c.bf16 %v2011_v4, %v2010_v2 }
 0x48c   : > { %v1563_v7 = vmul.f32 1.442695, %v1556_v6  ;;  %v2006_v6 = vld [vmem:[#allocation14 + $0x10] sm:$0xff] }
 0x48e   : > { %4105 = vpow2.f32 %v1563_v7  ;;  %v2007_v7 = vld [vmem:[#allocation14 + $0x18] sm:$0xff] }
 0x490   : > { %v4102_v8 = vpop.eup %4101 }
 0x491   : > { %v1568_v9 = vsel %vm1240_vm2, %v4102_v8, 0.0 }
 0x492   : > { %1569 = vadd.xlane.f32.xlu0 %v1568_v9  ;;  %v3886_v9 = vpack.c.bf16 %v2007_v7, %v2006_v6 }
 0x494   : > { %v4104_v11 = vpop.eup %4103 }
 0x495   : > { %v1571_v12 = vsel %vm1240_vm2, %v4104_v11, 0.0 }
 0x496   : > { %1572 = vadd.xlane.f32.xlu1 %v1571_v12 }
 0x498   : > { %v4106_v13 = vpop.eup %4105 }
 0x499   : > { %v1574_v14 = vsel %vm1240_vm2, %v4106_v13, 0.0 }
 0x49a   : > { %1575 = vadd.xlane.f32.xlu0 %v1574_v14 }
 0x4a7   : > { %1237 = vrot.lane.b32.xlu1 %v5280_v21, %s4625_s17 }
 0x4b0   : > { %1234 = vrot.lane.b32.xlu0 %v5280_v21, %s4623_s22 }
 0x4b6   : > { %v1567_v15 = vpop.xlane.xlu1 %1566 }
 0x4b7   : > { %4107 = vrcp.f32 %v1567_v15 }
 0x4c1   : > { %v4108_v16 = vpop.eup %4107 }
 0x4c2   : > { %v1581_v17 = vmul.f32 %v4108_v16, %v4100_v58 }
 0x4c4   : > { %3700 = vmatmul.mubr.msk.f32.vlgmr.msra.gmra.mrb[2].mxu0 %vm1240_vm2, %v1581_v17 }
 0x4c5   : > { %3709 = vmatprep.mubr.msk.f32.mxu0 %vm4621_vm0, %v4622_v1 }
 0x51f   : > { %v1570_v18 = vpop.xlane.xlu0 %1569 }
 0x520   : > { %4109 = vrcp.f32 %v1570_v18 }
 0x523   : > { %v1573_v19 = vpop.xlane.xlu1 %1572 }
 0x524   : > { %4111 = vrcp.f32 %v1573_v19 }
 0x527   : > { %v1576_v20 = vpop.xlane.xlu0 %1575  ;;  %v1238_v21 = vpop.permute.xlu1 %1237 }
 0x528   : > { %4113 = vrcp.f32 %v1576_v20 }
 0x52a   : > { %v4110_v22 = vpop.eup %4109 }
 0x52b   : > { %v1582_v23 = vmul.f32 %v4110_v22, %v4102_v8  ;;  %v1235_v24 = vpop.permute.xlu0 %1234  ;;  %v981_v8 = vld [vmem:[%s863_s10] sm:$0xff]  ;;  %s5753_s10 = sld [smem:[#allocation55_spill]] }
 0x52c   : > { %3708 = vmatpush3.msra.mxu0 %v1235_v24 }
 0x52d   : > { %3705 = vmatmul.mubr.msk.f32.vlgmr.msra.gmra.mrb[12].mxu1 %vm1240_vm2, %v1582_v23  ;;  %3876 = vmatprep.subr.bf16.mxu0 %v4620_v0  ;;  %v3520_v23 = vld [vmem:[#allocation11] ss:$0 sm:$0xff] }
 0x52e   : > { %v4112_v25 = vpop.eup %4111  ;;  %3713 = vmatpush3.msra.mxu1 %v1238_v21  ;;  %3714 = vmatprep.mubr.msk.f32.mxu1 %vm4621_vm0, %v4622_v1  ;;  %v3521_v21 = vld [vmem:[#allocation13] ss:$0 sm:$0xff] }
 0x52f   : > { %v1583_v26 = vmul.f32 %v4112_v25, %v4104_v11  ;;  %3882 = vmatprep.subr.bf16.mxu1 %v4620_v0 }
 0x531   : > { %3710 = vmatmul.mubr.msk.f32.vlgmr.msra.gmra.mrb[4].mxu0 %vm1240_vm2, %v1583_v26 }
 0x532   : > { %v4114_v27 = vpop.eup %4113  ;;  %3725 = vmatprep.mubr.msk.f32.mxu0 %vm4621_vm0, %v4622_v1  ;;  %3878 = vmatpush3.bf16.msra.mxu0 %v3877_v33 }
 0x533   : > { %v1584_v28 = vmul.f32 %v4114_v27, %v4106_v13  ;;  %3879 = vmatprep.subr.bf16.mxu0 %v4620_v0  ;;  %v980_v13 = vld [vmem:[%s854_s19] sm:$0xff]  ;;  %s5748_s19 = smov 16  }
 0x535   : > { %3715 = vmatmul.mubr.msk.f32.vlgmr.msra.gmra.mrb[14].mxu1 %vm1240_vm2, %v1584_v28 }
 0x536   : > { %3736 = vmatprep.mubr.msk.f32.mxu1 %vm4621_vm0, %v4622_v1  ;;  %3881 = vmatpush3.bf16.msra.mxu0 %v3880_v36 }
 0x537   : > { %3888 = vmatprep.subr.bf16.mxu0 %v4620_v0  ;;  %3884 = vmatpush3.bf16.msra.mxu1 %v3883_v3 }
 0x538   : > { %3885 = vmatprep.subr.bf16.mxu1 %v4620_v0 }
 0x53b   : > { %3887 = vmatpush3.bf16.msra.mxu1 %v3886_v9 }
 0x53c   : > { %3894 = vmatprep.subr.bf16.mxu1 %v4620_v0 }
 0x53e   : > { %3737 = vmatmul.mubr.msk.f32.vlgmr.msra.gmra.mrb[16].mxu1 %vm1002_vm1, %v980_v13 }
 0x53f   : > { %3758 = vmatprep.mubr.msk.f32.mxu1 %vm4621_vm0, %v4622_v1 }
 0x597   : > { %v1654_v29 = vpop.f32.mrb[2].mxu0 }
 0x598   : > { %v3701_v30 = vpop.f32.mrb[3].mxu0 }
 0x600   : > { %v1727_v37 = vpop.f32.mrb[12].mxu1 }
 0x601   : > { %1878 = vrot.lane.b32.xlu1 %v1727_v37, %s5671_s3  ;;  %v3706_v38 = vpop.f32.mrb[13].mxu1  ;;  %s5752_s3 = sld [smem:[#allocation53_spill]] }
 0x604   : > { %v1800_v39 = vpop.f32.mrb[4].mxu0 }
 0x605   : > { %1882 = vrot.lane.b32.xlu0 %v1800_v39, %s5672_s12  ;;  %v3711_v40 = vpop.f32.mrb[5].mxu0  ;;  %s5751_s12 = sld [smem:[#allocation54_spill]] }
 0x608   : > { %v1873_v41 = vpop.f32.mrb[14].mxu1 }
 0x609   : > { %1886 = vrot.lane.b32.xlu1 %v1873_v41, %s5670_s30  ;;  %v3716_v42 = vpop.f32.mrb[15].mxu1  ;;  %s5747_s30 = sld [smem:[#allocation48_spill]] }
 0x60f   : > { %v2012_v11 = vld [vmem:[%s5747_s30] sm:$0xff]  ;;  %v2013_v12 = vld [vmem:[%s5747_s30 + $0x8] sm:$0xff]  ;;  %v2014_v15 = vld [vmem:[%s5747_s30 + $0x10] sm:$0xff] }
 0x610   : > { %v3895_v14 = vpack.c.bf16 %v2013_v12, %v2012_v11  ;;  %v2015_v16 = vld [vmem:[%s5747_s30 + $0x18] sm:$0xff] }
 0x611   : > { %v3898_v17 = vpack.c.bf16 %v2015_v16, %v2014_v15 }
 0x612   : > { %3896 = vmatpush3.bf16.msra.mxu1 %v3895_v14 }
 0x613   : > { %3897 = vmatprep.subr.bf16.mxu1 %v4620_v0 }
 0x616   : > { %3899 = vmatpush3.bf16.msra.mxu1 %v3898_v17 }
 0x617   : > { %3766 = vmatprep.subr.mxu1 %v4622_v1 }
 0x673   : > { %v1879_v43 = vpop.permute.xlu1 %1878 }
 0x674   : > { %v1889_v45 = vsel %vm1240_vm2, %v1654_v29, %v1879_v43  ;;  %v5417_v29 = vpop.f32.mrb[16].mxu1 }
 0x675   : > { %v3738_v30 = vpop.f32.mrb[17].mxu1 }
 0x676   : > { %v2017_v30 = vld [vmem:[#allocation16 + $0x8] sm:$0xff] }
 0x677   : > { %v1883_v44 = vpop.permute.xlu0 %1882 }
 0x678   : > { %v1891_v46 = vsel %vm1890_vm4, %v1889_v45, %v1883_v44 }
 0x67b   : > { %v1887_v47 = vpop.permute.xlu1 %1886 }
 0x67c   : > { %v1893_v48 = vsel %vm1892_vm5, %v1891_v46, %v1887_v47 }
 0x67d   : > { %3726 = vmatmul.mubr.msk.f32.vlgmr.msra.gmra.mrb[6].mxu0 %vm1002_vm1, %v1893_v48 }
 0x67e   : > { %3747 = vmatprep.mubr.msk.f32.mxu0 %vm4621_vm0, %v4622_v1 }
 0x750   : > { %v1969_v50 = vpop.f32.mrb[6].mxu0 }
 0x751   : > { %v1970_v51 = vadd.f32 %v3518_v49, %v1969_v50  ;;  %v3727_v52 = vpop.f32.mrb[7].mxu0 }
 0x753   : > { %v1973_v53 = vadd.f32 %v1970_v51, %v5243_v10  ;;  %v3889_v10 = vpack.c.bf16 %v2009_v61, %v2008_v60 }
 0x755   : > { %v1976_v54 = vsel %vm1002_vm1, %v1973_v53, 0.0  ;;  %3890 = vmatpush3.bf16.msra.mxu0 %v3889_v10 }
 0x756   : > { %1977 = vadd.xlane.f32.xlu0 %v1976_v54  ;;  %3891 = vmatprep.subr.bf16.mxu0 %v4620_v0 }
 0x759   : > { %3893 = vmatpush3.bf16.msra.mxu0 %v3892_v5 }
 0x75a   : > { %3761 = vmatprep.subr.mxu0 %v4622_v1 }
 0x75c   : > { %3748 = vmatmul.mubr.msk.f32.vlgmr.msra.gmra.mrb[8].mxu0 %vm1002_vm1, %v981_v8 }
 0x75d   : > { %3763 = vmatprep.mubr.msk.f32.mxu0 %vm4621_vm0, %v4622_v1 }
 0x7e3   : > { %v1978_v55 = vpop.xlane.xlu0 %1977 }
 0x7e4   : > { %v1980_v56 = vmul.f32 0.03125, %v1978_v55 }
 0x7e6   : > { %v1981_v57 = vsub.f32 %v1973_v53, %v1980_v56 }
 0x7e8   : > { %v1982_v58 = vmul.f32 %v1981_v57, %v1981_v57 }
 0x7ea   : > { %v1983_v59 = vsel %vm1002_vm1, %v1982_v58, 0.0 }
 0x7eb   : > { %1984 = vadd.xlane.f32.xlu1 %v1983_v59 }
 0x82f   : > { %v2163_v27 = vpop.f32.mrb[8].mxu0 }
 0x830   : > { %2248 = vrot.lane.b32.xlu0 %v2163_v27, %s4624_s20  ;;  %v3749_v28 = vpop.f32.mrb[9].mxu0  ;;  %2252 = vrot.lane.b32.xlu1 %v2163_v27, %s4625_s17 }
 0x831   : > { %3762 = vmatpush3.xpose.msk.msra.mxu0 %vm1240_vm2, %v2163_v27 }
 0x832   : > { %3771 = vmatprep.subr.mxu0 %v4622_v1 }
 0x834   : > { %2250 = vrot.lane.b32.xlu0 %v2163_v27, %s4623_s22 }
 0x878   : > { %v1985_v18 = vpop.xlane.xlu1 %1984 }
 0x879   : > { %v1986_v19 = vmul.f32 0.03125, %v1985_v18 }
 0x87b   : > { %v1987_v20 = vadd.f32 1e-05, %v1986_v19 }
 0x87d   : > { %4115 = vrsqrt.f32 %v1987_v20 }
 0x887   : > { %v4116_v22 = vpop.eup %4115 }
 0x888   : > { %v1989_v24 = vmul.f32 %v4116_v22, %v1981_v57 }
 0x88a   : > { %v1996_v25 = vmul.f32 %v3520_v23, %v1989_v24 }
 0x88c   : > { %v5408_v26 = vadd.f32 %v3521_v21, %v1996_v25 }
 0x88e   : > { %3759 = vmatmul.mubr.msk.f32.vlgmr.msra.gmra.mrb[18].mxu1 %vm1002_vm1, %v5408_v26 }
 0x88f   : > { %3768 = vmatprep.mubr.msk.f32.mxu1 %vm4621_vm0, %v4622_v1 }
 0x8a2   : > { %v2249_v31 = vpop.permute.xlu0 %2248  ;;  %v2253_v35 = vpop.permute.xlu1 %2252 }
 0x8a3   : > { %3767 = vmatpush3.xpose.msk.msra.mxu1 %vm1240_vm2, %v2249_v31 }
 0x8a4   : > { %3776 = vmatprep.subr.mxu1 %v4622_v1 }
 0x8a6   : > { %v2251_v33 = vpop.permute.xlu0 %2250 }
 0x961   : > { %v2236_v32 = vpop.f32.mrb[18].mxu1 }
 0x962   : > { %2243 = vrot.lane.b32.xlu0 %v2236_v32, %s4623_s22  ;;  %2241 = vrot.lane.b32.xlu1 %v2236_v32, %s4624_s20  ;;  %v3760_v34 = vpop.f32.mrb[19].mxu1 }
 0x963   : > { %3764 = vmatmul.mubr.msk.f32.vlgmr.msra.gmra.mrb[10].mxu0 %vm1240_vm2, %v2236_v32  ;;  %v2018_v34 = vld [vmem:[#allocation16 + $0x10] sm:$0xff] }
 0x964   : > { %3772 = vmatpush3.xpose.msk.msra.mxu0 %vm1240_vm2, %v2251_v33  ;;  %3773 = vmatprep.mubr.msk.f32.mxu0 %vm4621_vm0, %v4622_v1 }
 0x965   : > { %3781 = vmatprep.subr.mxu0 %v4622_v1 }
 0x966   : > { %2245 = vrot.lane.b32.xlu1 %v2236_v32, %s4625_s17 }
 0x9d4   : > { %v2244_v36 = vpop.permute.xlu0 %2243  ;;  %v2242_v37 = vpop.permute.xlu1 %2241 }
 0x9d5   : > { %3769 = vmatmul.mubr.msk.f32.vlgmr.msra.gmra.mrb[20].mxu1 %vm1240_vm2, %v2242_v37  ;;  %3774 = vmatmul.mubr.msk.f32.vlgmr.msra.gmra.mrb[12].mxu0 %vm1240_vm2, %v2244_v36 }
 0x9d6   : > { %3777 = vmatpush3.xpose.msk.msra.mxu1 %vm1240_vm2, %v2253_v35  ;;  %3782 = vmatpush3.msra.mxu0 %v5417_v29  ;;  %v2019_v35 = vld [vmem:[#allocation16 + $0x18] sm:$0xff] }
 0x9d7   : > { %3778 = vmatprep.mubr.msk.f32.mxu1 %vm4621_vm0, %v4622_v1  ;;  %3786 = vmatprep.subr.mxu1 %v4622_v1  ;;  %v3904_v36 = vpack.c.bf16 %v2019_v35, %v2018_v34  ;;  %v3541_v35 = vld [vmem:[%s5752_s3] ss:$0 sm:$0xff]  ;;  %s978_s3 = scalar_lea.vmem [#allocation23], %s5176_s6 }
 0x9d8   : > { %v2246_v38 = vpop.permute.xlu1 %2245  ;;  %3783 = vmatprep.mubr.msk.f32.mxu0 %vm4621_vm0, %v4622_v1  ;;  %3791 = vmatprep.subr.mxu0 %v4622_v1  ;;  %s3247_s7 = sshll.u32 %s978_s3, 4  ;;  %s5565_s7 = int_to_ptr.vmem [resolvable:$true] %s3247_s7 }
 0x9d9   : > { %3779 = vmatmul.mubr.msk.f32.vlgmr.msra.gmra.mrb[22].mxu1 %vm1240_vm2, %v2246_v38  ;;  %s4509_s21 = scalar_lea.vmem %s5565_s7, 128 }
 0x9da   : > { %3788 = vmatprep.mubr.msk.f32.mxu1 %vm4621_vm0, %v4622_v1  ;;  %p4510_p5 = scmp.ne.s32.totalorder %s5565_s7, %s4509_s21 }
 0x9dc   : > { %p4511_p3 = pnand %p4510_p5, %p5757_p7 }
 0x9de   : > { %p4512_p10 = pneg %p4511_p3 }
 0xa36   : > { %v2334_v39 = vpop.f32.mrb[10].mxu0 }
 0xa37   : > { %v2560_v40 = vmul.f32 0.17677669, %v2334_v39  ;;  %v3765_v41 = vpop.f32.mrb[11].mxu0 }
 0xa39   : > { %v2564_v42 = vsel %vm1240_vm2, %v2560_v40, -inf }
 0xa3a   : > { %2565 = vmax.xlane.f32.xlu0 %v2564_v42 }
 0xaa8   : > { %v2408_v43 = vpop.f32.mrb[20].mxu1  ;;  %v2482_v44 = vpop.f32.mrb[12].mxu0 }
 0xaa9   : > { %v2561_v45 = vmul.f32 0.17677669, %v2408_v43  ;;  %v2562_v46 = vmul.f32 0.17677669, %v2482_v44  ;;  %v3770_v47 = vpop.f32.mrb[21].mxu1  ;;  %v3775_v48 = vpop.f32.mrb[13].mxu0 }
 0xaab   : > { %v2570_v49 = vsel %vm1240_vm2, %v2562_v46, -inf  ;;  %v2567_v50 = vsel %vm1240_vm2, %v2561_v45, -inf }
 0xaac   : > { %2571 = vmax.xlane.f32.xlu0 %v2570_v49  ;;  %2568 = vmax.xlane.f32.xlu1 %v2567_v50  ;;  %v2556_v51 = vpop.f32.mrb[22].mxu1  ;;  %v3537_v49 = vld [vmem:[#allocation17] ss:$0 sm:$0xff] }
 0xaad   : > { %v2563_v52 = vmul.f32 0.17677669, %v2556_v51  ;;  %v3780_v53 = vpop.f32.mrb[23].mxu1 }
 0xaaf   : > { %v2573_v54 = vsel %vm1240_vm2, %v2563_v52, -inf }
 0xab0   : > { %2574 = vmax.xlane.f32.xlu0 %v2573_v54 }
 0xabd   : > { %2255 = vrot.lane.b32.xlu1 %v5417_v29, %s4624_s20  ;;  %s5750_s20 = smov 24  }
 0xac7   : > { %v2566_v55 = vpop.xlane.xlu0 %2565 }
 0xac8   : > { %v2576_v56 = vsub.f32 %v2560_v40, %v2566_v55 }
 0xaca   : > { %v2580_v57 = vmul.f32 1.442695, %v2576_v56 }
 0xacc   : > { %4117 = vpow2.f32 %v2580_v57 }
 0xad6   : > { %v4118_v58 = vpop.eup %4117 }
 0xad7   : > { %v2588_v59 = vsel %vm1240_vm2, %v4118_v58, 0.0 }
 0xae1   : > { %2589 = vadd.xlane.f32.xlu1 %v2588_v59 }
 0xb39   : > { %v2572_v60 = vpop.xlane.xlu0 %2571  ;;  %v2569_v61 = vpop.xlane.xlu1 %2568 }
 0xb3a   : > { %v2578_v10 = vsub.f32 %v2562_v46, %v2572_v60  ;;  %v2577_v62 = vsub.f32 %v2561_v45, %v2569_v61  ;;  %v3024_v60 = vld [vmem:[#allocation22] sm:$0xff]  ;;  %v3025_v61 = vld [vmem:[#allocation22 + $0x8] sm:$0xff] }
 0xb3c   : > { %v2584_v63 = vmul.f32 1.442695, %v2578_v10  ;;  %v2582_v2 = vmul.f32 1.442695, %v2577_v62  ;;  %v3907_v10 = vpack.c.bf16 %v3025_v61, %v3024_v60  ;;  %v3027_v62 = vld [vmem:[#allocation22 + $0x18] sm:$0xff] }
 0xb3d   : > { %v2256_v3 = vpop.permute.xlu1 %2255  ;;  %v2575_v4 = vpop.xlane.xlu0 %2574 }
 0xb3e   : > { %4119 = vpow2.f32 %v2584_v63  ;;  %v2579_v5 = vsub.f32 %v2563_v52, %v2575_v4  ;;  %3787 = vmatpush3.msra.mxu1 %v2256_v3  ;;  %v3111_v3 = vld [vmem:[%s5751_s12 + $0x10] sm:$0xff] }
 0xb3f   : > { %4121 = vpow2.f32 %v2582_v2  ;;  %3796 = vmatprep.subr.mxu1 %v4622_v1  ;;  %v3110_v2 = vld [vmem:[%s5751_s12 + $0x8] sm:$0xff] }
 0xb40   : > { %v2586_v6 = vmul.f32 1.442695, %v2579_v5  ;;  %v3112_v5 = vld [vmem:[%s5751_s12 + $0x18] sm:$0xff] }
 0xb42   : > { %4123 = vpow2.f32 %v2586_v6  ;;  %v3916_v6 = vpack.c.bf16 %v3112_v5, %v3111_v3 }
 0xb48   : > { %v4120_v7 = vpop.eup %4119 }
 0xb49   : > { %v4122_v8 = vpop.eup %4121  ;;  %v2594_v9 = vsel %vm1240_vm2, %v4120_v7, 0.0 }
 0xb4a   : > { %2595 = vadd.xlane.f32.xlu1 %v2594_v9  ;;  %v2591_v11 = vsel %vm1240_vm2, %v4122_v8, 0.0 }
 0xb4b   : > { %2592 = vadd.xlane.f32.xlu0 %v2591_v11  ;;  %v3115_v11 = vld [vmem:[%s5751_s12 + $0x30] sm:$0xff] }
 0xb4c   : > { %v4124_v12 = vpop.eup %4123 }
 0xb4d   : > { %v2597_v13 = vsel %vm1240_vm2, %v4124_v12, 0.0 }
 0xb4f   : > { %2598 = vadd.xlane.f32.xlu0 %v2597_v13 }
 0xb5b   : > { %2261 = vrot.lane.b32.xlu1 %v5417_v29, %s4625_s17  ;;  %s3547_s17 = sshll.u32 %s4776_s29, 7  ;;  %s4629_s29 = smov [#allocation23]  }
 0xb5c   : > { %s5563_s2 = scalar_lea.hbm %s5756_s0, %s3547_s17  ;;  %s4513_s6 = sshll.u32 %s4629_s29, 4  ;;  %s4514_s6 = int_to_ptr.vmem [resolvable:$false] %s4513_s6 }
 0xb5d   : > { %p4516_p13 = scmp.lt.s32.totalorder %s5565_s7, %s4514_s6 }
 0xb65   : > { %2258 = vrot.lane.b32.xlu0 %v5417_v29, %s4623_s22  ;;  %v2016_v29 = vld [vmem:[#allocation16] sm:$0xff]  ;;  %s5749_s22 = smov 8  }
 0xb66   : > { %v3901_v31 = vpack.c.bf16 %v2017_v30, %v2016_v29  ;;  %v3540_v30 = vld [vmem:[#allocation20] ss:$0 sm:$0xff] }
 0xb6e   : > { %v2590_v14 = vpop.xlane.xlu1 %2589 }
 0xb6f   : > { %4125 = vrcp.f32 %v2590_v14  ;;  %v3117_v14 = vld [vmem:[%s5751_s12 + $0x40] sm:$0xff] }
 0xb79   : > { %v4126_v15 = vpop.eup %4125 }
 0xb7a   : > { %v2604_v16 = vmul.f32 %v4126_v15, %v4118_v58  ;;  %v3118_v15 = vld [vmem:[%s5751_s12 + $0x48] sm:$0xff] }
 0xb7c   : > { %3784 = vmatmul.mubr.msk.f32.vlgmr.msra.gmra.mrb[14].mxu0 %vm1240_vm2, %v2604_v16  ;;  %v3925_v16 = vpack.c.bf16 %v3118_v15, %v3117_v14 }
 0xb7d   : > { %3793 = vmatprep.mubr.msk.f32.mxu0 %vm4621_vm0, %v4622_v1 }
 0xbd7   : > { %v2596_v17 = vpop.xlane.xlu1 %2595 }
 0xbd8   : > { %4127 = vrcp.f32 %v2596_v17  ;;  %v2593_v18 = vpop.xlane.xlu0 %2592  ;;  %v3119_v17 = vld [vmem:[%s5751_s12 + $0x50] sm:$0xff] }
 0xbd9   : > { %4129 = vrcp.f32 %v2593_v18  ;;  %v3120_v18 = vld [vmem:[%s5751_s12 + $0x58] sm:$0xff] }
 0xbdb   : > { %v2262_v25 = vpop.permute.xlu1 %2261 }
 0xbdc   : > { %v2599_v19 = vpop.xlane.xlu0 %2598 }
 0xbdd   : > { %4131 = vrcp.f32 %v2599_v19  ;;  %v3928_v19 = vpack.c.bf16 %v3120_v18, %v3119_v17 }
 0xbe0   : > { %v2259_v20 = vpop.permute.xlu0 %2258 }
 0xbe1   : > { %3792 = vmatpush3.msra.mxu0 %v2259_v20  ;;  %v3121_v20 = vld [vmem:[%s5751_s12 + $0x60] sm:$0xff] }
 0xbe2   : > { %v4128_v22 = vpop.eup %4127  ;;  %3900 = vmatprep.subr.bf16.mxu0 %v4620_v0 }
 0xbe3   : > { %v4130_v23 = vpop.eup %4129  ;;  %v2606_v24 = vmul.f32 %v4128_v22, %v4120_v7  ;;  %v3113_v7 = vld [vmem:[%s5751_s12 + $0x20] sm:$0xff]  ;;  %v3122_v22 = vld [vmem:[%s5751_s12 + $0x68] sm:$0xff] }
 0xbe4   : > { %v2605_v21 = vmul.f32 %v4130_v23, %v4122_v8  ;;  %v3114_v8 = vld [vmem:[%s5751_s12 + $0x28] sm:$0xff]  ;;  %v3931_v23 = vpack.c.bf16 %v3122_v22, %v3121_v20 }
 0xbe5   : > { %3794 = vmatmul.mubr.msk.f32.vlgmr.msra.gmra.mrb[16].mxu0 %vm1240_vm2, %v2606_v24  ;;  %v3919_v9 = vpack.c.bf16 %v3114_v8, %v3113_v7 }
 0xbe6   : > { %3789 = vmatmul.mubr.msk.f32.vlgmr.msra.gmra.mrb[24].mxu1 %vm1240_vm2, %v2605_v21  ;;  %3809 = vmatprep.mubr.msk.f32.mxu0 %vm4621_vm0, %v4622_v1 }
 0xbe7   : > { %v4132_v27 = vpop.eup %4131  ;;  %3797 = vmatpush3.msra.mxu1 %v2262_v25  ;;  %3798 = vmatprep.mubr.msk.f32.mxu1 %vm4621_vm0, %v4622_v1 }
 0xbe8   : > { %v2607_v28 = vmul.f32 %v4132_v27, %v4124_v12  ;;  %3906 = vmatprep.subr.bf16.mxu1 %v4620_v0  ;;  %3902 = vmatpush3.bf16.msra.mxu0 %v3901_v31  ;;  %v3116_v12 = vld [vmem:[%s5751_s12 + $0x38] sm:$0xff] }
 0xbe9   : > { %3903 = vmatprep.subr.bf16.mxu0 %v4620_v0  ;;  %v3922_v13 = vpack.c.bf16 %v3116_v12, %v3115_v11 }
 0xbea   : > { %3799 = vmatmul.mubr.msk.f32.vlgmr.msra.gmra.mrb[26].mxu1 %vm1240_vm2, %v2607_v28  ;;  %v3539_v28 = vld [vmem:[#allocation19] ss:$0 sm:$0xff] }
 0xbeb   : > { %3820 = vmatprep.mubr.msk.f32.mxu1 %vm4621_vm0, %v4622_v1  ;;  %3908 = vmatpush3.bf16.msra.mxu1 %v3907_v10 }
 0xbec   : > { %3905 = vmatpush3.bf16.msra.mxu0 %v3904_v36  ;;  %3909 = vmatprep.subr.bf16.mxu1 %v4620_v0 }
 0xbed   : > { %3912 = vmatprep.subr.bf16.mxu0 %v4620_v0 }
 0xc4f   : > { %v2677_v32 = vpop.f32.mrb[14].mxu0 }
 0xc50   : > { %v3785_v33 = vpop.f32.mrb[15].mxu0 }
 0xc51   : > { %v3123_v33 = vld [vmem:[%s5751_s12 + $0x70] sm:$0xff] }
 0xcb8   : > { %v2823_v37 = vpop.f32.mrb[16].mxu0 }
 0xcb9   : > { %v2750_v38 = vpop.f32.mrb[24].mxu1  ;;  %2905 = vrot.lane.b32.xlu0 %v2823_v37, %s5748_s19  ;;  %v3795_v39 = vpop.f32.mrb[17].mxu0 }
 0xcba   : > { %2901 = vrot.lane.b32.xlu1 %v2750_v38, %s5749_s22  ;;  %v3790_v40 = vpop.f32.mrb[25].mxu1 }
 0xcbb   : > { %v3543_v40 = vld [vmem:[%s5753_s10] ss:$0 sm:$0xff] }
 0xcbd   : > { %v2896_v41 = vpop.f32.mrb[26].mxu1 }
 0xcbe   : > { %2909 = vrot.lane.b32.xlu1 %v2896_v41, %s5750_s20  ;;  %v3800_v42 = vpop.f32.mrb[27].mxu1  ;;  %s5755_s20 = sld [smem:[#allocation57_spill]] }
 0xd2b   : > { %v2906_v44 = vpop.permute.xlu0 %2905 }
 0xd2c   : > { %v2902_v43 = vpop.permute.xlu1 %2901 }
 0xd2d   : > { %v2912_v45 = vsel %vm1240_vm2, %v2677_v32, %v2902_v43 }
 0xd2e   : > { %v2913_v46 = vsel %vm1890_vm4, %v2912_v45, %v2906_v44 }
 0xd30   : > { %v2910_v47 = vpop.permute.xlu1 %2909 }
 0xd31   : > { %v2914_v48 = vsel %vm1892_vm5, %v2913_v46, %v2910_v47 }
 0xd32   : > { %3810 = vmatmul.mubr.msk.f32.vlgmr.msra.gmra.mrb[18].mxu0 %vm1002_vm1, %v2914_v48 }
 0xd33   : > { %3855 = vmatprep.mubr.msk.f32.mxu0 %vm4621_vm0, %v4622_v1  ;;  %v3026_v1 = vld [vmem:[#allocation22 + $0x10] sm:$0xff] }
 0xd34   : > { %v3910_v63 = vpack.c.bf16 %v3027_v62, %v3026_v1 }
 0xd36   : > { %3911 = vmatpush3.bf16.msra.mxu1 %v3910_v63 }
 0xe05   : > { %v2990_v50 = vpop.f32.mrb[18].mxu0 }
 0xe06   : > { %v2991_v51 = vadd.f32 %v3537_v49, %v2990_v50  ;;  %v3811_v52 = vpop.f32.mrb[19].mxu0 }
 0xe08   : > { %v2994_v53 = vadd.f32 %v2991_v51, %v5408_v26  ;;  %v3109_v26 = vld [vmem:[%s5751_s12] sm:$0xff] }
 0xe09   : > { %v3913_v4 = vpack.c.bf16 %v3110_v2, %v3109_v26 }
 0xe0a   : > { %v2997_v54 = vsel %vm1002_vm1, %v2994_v53, 0.0 }
 0xe0b   : > { %2998 = vadd.xlane.f32.xlu0 %v2997_v54  ;;  %3914 = vmatpush3.bf16.msra.mxu0 %v3913_v4 }
 0xe0c   : > { %3915 = vmatprep.subr.bf16.mxu0 %v4620_v0 }
 0xe0f   : > { %3917 = vmatpush3.bf16.msra.mxu0 %v3916_v6 }
 0xe10   : > { %3918 = vmatprep.subr.bf16.mxu0 %v4620_v0 }
 0xe13   : > { %3920 = vmatpush3.bf16.msra.mxu0 %v3919_v9 }
 0xe14   : > { %3921 = vmatprep.subr.bf16.mxu0 %v4620_v0 }
 0xe17   : > { %3923 = vmatpush3.bf16.msra.mxu0 %v3922_v13 }
 0xe18   : > { %3924 = vmatprep.subr.bf16.mxu0 %v4620_v0 }
 0xe1b   : > { %3926 = vmatpush3.bf16.msra.mxu0 %v3925_v16 }
 0xe1c   : > { %3927 = vmatprep.subr.bf16.mxu0 %v4620_v0 }
 0xe1f   : > { %3929 = vmatpush3.bf16.msra.mxu0 %v3928_v19 }
 0xe20   : > { %3930 = vmatprep.subr.bf16.mxu0 %v4620_v0 }
 0xe23   : > { %3932 = vmatpush3.bf16.msra.mxu0 %v3931_v23 }
 0xe24   : > { %3933 = vmatprep.subr.bf16.mxu0 %v4620_v0  ;;  %v3124_v0 = vld [vmem:[%s5751_s12 + $0x78] sm:$0xff] }
 0xe25   : > { %v3934_v34 = vpack.c.bf16 %v3124_v0, %v3123_v33 }
 0xe27   : > { %3935 = vmatpush3.bf16.msra.mxu0 %v3934_v34 }
 0xe98   : > { %v2999_v55 = vpop.xlane.xlu0 %2998 }
 0xe99   : > { %v3000_v56 = vmul.f32 0.03125, %v2999_v55  ;;  %v3544_v55 = vld [vmem:[%s5754_s1] ss:$0 sm:$0xff]  ;;  %s4515_s1 = scalar_lea.vmem %s4514_s6, 256 }
 0xe9a   : > { %p4517_p9 = scmp.lt.s32.totalorder %s4515_s1, %s4509_s21 }
 0xe9b   : > { %v3001_v57 = vsub.f32 %v2994_v53, %v3000_v56 }
 0xe9c   : > { %p4518_p8 = por %p4517_p9, %p4516_p13 }
 0xe9d   : > { %v3002_v58 = vmul.f32 %v3001_v57, %v3001_v57 }
 0xe9e   : > { %p4519_p4 = pnand %p4518_p8, %p4512_p10 }
 0xe9f   : > { %v3003_v59 = vsel %vm1002_vm1, %v3002_v58, 0.0 }
 0xea0   : > { %3004 = vadd.xlane.f32.xlu1 %v3003_v59 }
 0xf2d   : > { %v3005_v24 = vpop.xlane.xlu1 %3004 }
 0xf2e   : > { %v3006_v21 = vmul.f32 0.03125, %v3005_v24 }
 0xf30   : > { %v3007_v25 = vadd.f32 1e-05, %v3006_v21 }
 0xf32   : > { %4133 = vrsqrt.f32 %v3007_v25 }
 0xf3c   : > { %v4134_v27 = vpop.eup %4133 }
 0xf3d   : > { %v3009_v29 = vmul.f32 %v4134_v27, %v3001_v57  ;;  %v3545_v57 = vld [vmem:[%s5755_s20] ss:$0 sm:$0xff] }
 0xf3f   : > { %v3016_v31 = vmul.f32 %v3539_v28, %v3009_v29 }
 0xf41   : > { %v3023_v32 = vadd.f32 %v3540_v30, %v3016_v31 }
 0xf43   : > { %3821 = vmatmul.mubr.msk.f32.vlgmr.msra.gmra.mrb[28].mxu1 %vm1002_vm1, %v3023_v32 }
0x1016   : > { %v3104_v36 = vpop.f32.mrb[28].mxu1 }
0x1017   : > { %v3105_v37 = vadd.f32 %v3541_v35, %v3104_v36  ;;  %v3822_v38 = vpop.f32.mrb[29].mxu1 }
0x1019   : > { %v3108_v39 = vmax.f32 %v3105_v37, 0.0 }
0x101b   : > { %3856 = vmatmul.mubr.f32.vlgmr.msra.gmra.mrb[20].mxu0 %v3108_v39 }
0x10ee   : > { %v3198_v41 = vpop.f32.mrb[20].mxu0 }
0x10ef   : > { %v3199_v42 = vadd.f32 %v3543_v40, %v3198_v41  ;;  %v3857_v43 = vpop.f32.mrb[21].mxu0 }
0x10f1   : > { %v3202_v44 = vadd.f32 %v3199_v42, %v3023_v32 }
0x10f3   : > { %v3205_v45 = vsel %vm1002_vm1, %v3202_v44, 0.0 }
0x10f4   : > { %3206 = vadd.xlane.f32.xlu0 %v3205_v45 }
0x1181   : > { %v3207_v46 = vpop.xlane.xlu0 %3206 }
0x1182   : > { %v3208_v47 = vmul.f32 0.03125, %v3207_v46 }
0x1184   : > { %v3209_v48 = vsub.f32 %v3202_v44, %v3208_v47 }
0x1186   : > { %v3210_v49 = vmul.f32 %v3209_v48, %v3209_v48 }
0x1188   : > { %v3211_v50 = vsel %vm1002_vm1, %v3210_v49, 0.0 }
0x1189   : > { %3212 = vadd.xlane.f32.xlu0 %v3211_v50 }
0x1216   : > { %v3213_v51 = vpop.xlane.xlu0 %3212 }
0x1217   : > { %v3214_v52 = vmul.f32 0.03125, %v3213_v51 }
0x1219   : > { %v3215_v53 = vadd.f32 1e-05, %v3214_v52 }
0x121b   : > { %4135 = vrsqrt.f32 %v3215_v53 }
0x1225   : > { %v4136_v54 = vpop.eup %4135 }
0x1226   : > { %v3217_v56 = vmul.f32 %v4136_v54, %v3209_v48 }
0x1228   : > { %v3224_v58 = vmul.f32 %v3544_v55, %v3217_v56 }
0x122a   : > { %v3231_v59 = vadd.f32 %v3545_v57, %v3224_v58 }
0x122c   : > { %3232 = vst.msk [vmem:[%s978_s3] sm:$0xff] %vm1002_vm1, %v3231_v59 }
0x122d   : > { %4522 = shalt.err (!%p4519_p4)
}
0x122e   : > { %s4523_s15 = scalar_lea.hbm %s5563_s2, 128  ;;  %s4527_s20 = scalar_lea.hbm %s5756_s0, 256 }
0x122f   : > { %p4524_p1 = scmp.ne.s32.totalorder %s5563_s2, %s4523_s15  ;;  %p4528_p12 = scmp.lt.u32.totalorder %s5563_s2, %s5756_s0 }
0x1230   : > { %p4529_p6 = scmp.lt.u32.totalorder %s4527_s20, %s4523_s15  ;;  %p4531_p5 = scmp.lt.u32.totalorder %s4523_s15, %s5563_s2 }
0x1231   : > { %p4525_p0 = pnand %p4524_p1, %p5757_p7 }
0x1232   : > { %p4530_p11 = por %p4529_p6, %p4528_p12 }
0x1233   : > { %p4526_p2 = pneg %p4525_p0 }
0x1234   : > { %p4532_p3 = por %p4531_p5, %p4530_p11 }
0x1236   : > { %p4533_p10 = pnand %p4532_p3, %p4526_p2 }
0x1238   : > { %4536 = shalt.err (!%p4533_p10)
}
0x1239   : > { %3980 = dma.vmem_to_hbm [thread:$0]  (%p5757_p7), %s5565_s7, 128, %s5563_s2, %s3234_s24  }
0x123a PF: > { %s5758_s5 = sld [smem:[#allocation33_spill]]  ;;  %s5759_s10 = sld [smem:[#allocation36_spill]] }
0x123b   : > { %p5761_p9 = scmp.ge.s32.totalorder %s4603_s28, 2 }
0x1240   : > { %s3259_s21 = sand.u32 1, %s5758_s5   ;;  %p5760_p13 = scmp.ne.s32.totalorder %s5759_s10, 0 }
0x1241   : > { %s3260_s29 = scalar_lea.sflag [#allocation4], %s3259_s21 }
0x1242   : > { %p4024_p8 = pnand %p5761_p9, %p5760_p13 }
0x1244   : > { %4586 = dma.done.wait (!%p4024_p8), %s3260_s29, 128  }
0x1245   : > { %4588 = vsyncadd (!%p4024_p8), %s3260_s29, 4294967168  ;;  %s5762_s28 = sld [smem:[#allocation34_spill]]  ;;  %s5763_s6 = sld [smem:[#allocation35_spill]] }
0x1246   : > { %s5764_s5 = smov %s4595_s26  ;;  %s5765_s26 = smov %s4599_s27 }
0x124b   : > { %p47_p4 = scmp.ge.s32.totalorder %s5762_s28, 4   ;;  %s5766_s27 = smov %s5763_s6 }
0x124d   :  { %49 = sbr.rel (!%p47_p4) target bundleno = 36 (0x24), region = 234 }
0x1254   :  { %3265 = vsyncpa [#allocation3], 1 }
0x1255   :  { %3267 = vsyncpa [#allocation3 + $0x1], 1 }
0x1256   :  { %3268 = vsyncpa [#allocation6], 1 }
0x1257   :  { %3270 = vsyncpa [#allocation6 + $0x1], 1 }
0x1258   :  { %3271 = vsyncpa [#allocation9], 1 }
0x1259   :  { %3273 = vsyncpa [#allocation9 + $0x1], 1 }
0x125a   :  { %3274 = vsyncpa [#allocation12], 1 }
0x125b   :  { %3275 = vsyncpa [#allocation15], 1 }
0x125c   :  { %3276 = vsyncpa [#allocation18], 1 }
0x125d   :  { %3277 = vsyncpa [#allocation21], 1 }
0x125e   :  { %3278 = vsyncpa [#allocation4], 1 }
0x125f   :  { %3280 = vsyncpa [#allocation4 + $0x1], 1 }

</bundles_post_ra>
